<compile_context>
chip_gen: v6e
topology: v6e:2x2x1
jax: 0.10.0
libtpu: 0.0.40
codegen_flags: <defaults>
</compile_context>

<pallas_src>
import jax
import jax.numpy as jnp
from jax.experimental import pallas as pl
from jax.experimental.pallas import tpu as pltpu

DIM_IN = 768   # GRU input size (BERT hidden)
DIM_H = 50     # GRU hidden size per direction (small-shape stand-in)
DIM_TS = 7     # number of output labels
GP = 128       # padded per-gate lane block, SHARED by both directions
GH = 64        # bwd sub-block offset inside a gate block (fwd: 0..H-1, bwd: GH..GH+H-1)
GW = 3 * GP    # total gate width (r,z,n)
TSP = 128      # lane-padded label count

assert DIM_H <= GH and GH + DIM_H <= GP


def _gru_head_kernel(x_ref, wih_ref, bih_ref, whh_ref, bhn_ref, wts_ref, bts_ref,
                     out_ref, gi_ref, hs_ref):
    S, B, D = x_ref.shape

    # --- 1) Fused input projection: one bf16 MXU matmul over all timesteps, both
    #        directions and all three gates; b_ih (+ r/z b_hh) folded in; bf16 store. ---
    x = x_ref[...].reshape(S * B, D)                                          # bf16
    gi = jnp.dot(x, wih_ref[...], preferred_element_type=jnp.float32) + bih_ref[...]
    gi_ref[...] = gi.reshape(S, B, GW).astype(jnp.bfloat16)

    whh = whh_ref[...]                                        # (128, 384) bf16, block-diag per gate
    bhn = jnp.broadcast_to(bhn_ref[...], (B, GP))              # hoisted n-gate b_hh broadcast
    lane = jax.lax.broadcasted_iota(jnp.int32, (B, GW), 1)
    is_fwd = (lane & (GP - 1)) < GH                            # fwd half of every gate block

    # --- 2) Merged fwd+bwd recurrence: single loop over S, register-resident carry,
    #        one bf16 MXU matmul per step through the block-diagonal hidden weight. ---
    def step(i, h_prev):                                       # h_prev: (B, 128) f32
        tf = i
        tb = S - 1 - i
        # fwd lanes come from time tf, bwd lanes from time tb.
        gi_t = jnp.where(is_fwd, gi_ref[tf], gi_ref[tb]).astype(jnp.float32)
        gh = jnp.dot(h_prev.astype(jnp.bfloat16), whh,
                     preferred_element_type=jnp.float32)       # (B, 384)
        r = jax.nn.sigmoid(gi_t[:, 0 * GP:1 * GP] + gh[:, 0 * GP:1 * GP])
        z = jax.nn.sigmoid(gi_t[:, 1 * GP:2 * GP] + gh[:, 1 * GP:2 * GP])
        n = jnp.tanh(gi_t[:, 2 * GP:3 * GP] + r * (gh[:, 2 * GP:3 * GP] + bhn))
        h_new = n + z * (h_prev - n)                           # == (1-z)*n + z*h_prev
        hs_ref[tf, :, 0:GH] = h_new[:, 0:GH]                   # fwd half -> time tf
        hs_ref[tb, :, GH:GP] = h_new[:, GH:GP]                 # bwd half -> time tb
        return h_new

    jax.lax.fori_loop(0, S, step, jnp.zeros((B, GP), jnp.float32))

    # --- 3) Fused linear head + argmax. Pad-label lanes carry -1e30 bias so the
    #        argmax never selects them; ties resolve to the first index (torch-like). ---
    hs = hs_ref[...].reshape(S * B, GP).astype(jnp.bfloat16)
    logits = (jnp.dot(hs, wts_ref[...], preferred_element_type=jnp.float32)
              + bts_ref[...]).reshape(S, B, TSP)
    maxv = jnp.max(logits, axis=-1, keepdims=True)
    idx = jax.lax.broadcasted_iota(jnp.int32, logits.shape, 2)
    labels = jnp.min(jnp.where(logits >= maxv, idx, TSP), axis=-1)            # (S, B)
    out_ref[...] = jnp.transpose(labels)                                      # lane-dense (B, S)


def _pack_params(p):
    """Pack logical GRU + head weights into the compact shared-lane gate layout."""
    H, TS = DIM_H, DIM_TS
    f32 = jnp.float32

    def gate_block(wf, wb, rows):
        # (rows, 3H) fwd + (rows, 3H) bwd -> (rows, 3*GP): per gate, fwd in lanes
        # [0, H), bwd in lanes [GH, GH+H) of the shared 128-lane block.
        out = jnp.zeros((rows, GW), f32)
        for g in range(3):
            out = out.at[:, g * GP:g * GP + H].set(wf[:, g * H:(g + 1) * H])
            out = out.at[:, g * GP + GH:g * GP + GH + H].set(wb[:, g * H:(g + 1) * H])
        return out

    wih = gate_block(p["wih_f"], p["wih_b"], DIM_IN).astype(jnp.bfloat16)     # (768, 384)

    # Fold b_ih + (r,z parts of b_hh) into one bias row; the n-gate b_hh must stay
    # inside r * (...) and is kept separately (bhn).
    zeros_n = jnp.zeros((1, H), f32)
    bih_f = p["bih_f"] + jnp.concatenate([p["bhh_f"][:, :2 * H], zeros_n], axis=1)
    bih_b = p["bih_b"] + jnp.concatenate([p["bhh_b"][:, :2 * H], zeros_n], axis=1)
    bih = gate_block(bih_f, bih_b, 1)                                         # (1, 384) f32

    whh = jnp.zeros((GP, GW), f32)
    for g in range(3):
        whh = whh.at[0:H, g * GP:g * GP + H].set(p["whh_f"][:, g * H:(g + 1) * H])
        whh = whh.at[GH:GH + H, g * GP + GH:g * GP + GH + H].set(
            p["whh_b"][:, g * H:(g + 1) * H])
    whh = whh.astype(jnp.bfloat16)                                            # (128, 384)

    bhn = jnp.zeros((1, GP), f32)
    bhn = bhn.at[:, 0:H].set(p["bhh_f"][:, 2 * H:])
    bhn = bhn.at[:, GH:GH + H].set(p["bhh_b"][:, 2 * H:])                     # (1, 128)

    wts = jnp.zeros((GP, TSP), f32)
    wts = wts.at[0:H, 0:TS].set(p["wts_f"])
    wts = wts.at[GH:GH + H, 0:TS].set(p["wts_b"])
    wts = wts.astype(jnp.bfloat16)                                            # (128, 128)

    bts = jnp.full((1, TSP), -1e30, f32).at[:, 0:TS].set(p["bts"])            # (1, 128)
    return wih, bih, whh, bhn, wts, bts


def _round_up(x, m):
    return ((x + m - 1) // m) * m


def _vmem_limit_bytes():
    # Stay well under v7x's 64 MiB physical per-TC VMEM; raise above v5e's 16 MiB
    # scoped default; allow more headroom on v5e/v6e (128 MiB physical).
    try:
        cap = int(pltpu.get_tpu_info().vmem_capacity_bytes)
        return min(max(cap - (16 << 20), 32 << 20), 100 << 20)
    except Exception:
        return 48 << 20


def _choose_batch_tile(B, S, vmem_budget):
    b8 = max(8, _round_up(B, 8))

    def est_bytes(bt):
        return (2 * S * bt * DIM_IN * 2        # x block, bf16, double-buffered
                + S * bt * GW * 2              # gi scratch, bf16
                + S * bt * GP * 4              # hs scratch, f32
                + 2 * bt * S * 4               # int32 output block, double-buffered
                + (2 << 20))                   # weights (double-buffered) + margin

    bt = 8
    while bt < min(64, b8) and est_bytes(bt + 8) <= vmem_budget:
        bt += 8
    # Keep >=2 grid blocks when the batch allows it so the parallel axis can split
    # across TensorCores (v7x); tiny batches stay single-block.
    if b8 >= 16:
        bt = min(bt, _round_up(b8 // 2, 8))
    bt = min(bt, b8)
    n_blocks = pl.cdiv(b8, bt)
    return bt, n_blocks, n_blocks * bt


def token_gru_head_forward(sequence_output, params):
    """sequence_output: (B, S, 768) f32 -> predicted label ids (B, S) int32."""
    B, S, D = sequence_output.shape
    assert D == DIM_IN

    vmem_limit = _vmem_limit_bytes()
    bt, n_blocks, b_pad = _choose_batch_tile(B, S, max(vmem_limit - (8 << 20), 16 << 20))

    wih, bih, whh, bhn, wts, bts = _pack_params(params)

    # Time-major + bf16 cast (one cheap XLA relayout at these shapes).
    # TODO(synk): for very large B*S this relayout could be folded into the
    # kernel's input DMA (S-chunked projection grid) instead of a host-side pass.
    x = sequence_output
    if b_pad != B:
        x = jnp.pad(x, ((0, b_pad - B), (0, 0), (0, 0)))
    x = jnp.transpose(x, (1, 0, 2)).astype(jnp.bfloat16)                      # (S, b_pad, D)

    out = pl.pallas_call(
        _gru_head_kernel,
        out_shape=jax.ShapeDtypeStruct((b_pad, S), jnp.int32),
        grid=(n_blocks,),
        in_specs=[
            pl.BlockSpec((S, bt, D), lambda i: (0, i, 0)),    # x (time-major, bf16)
            pl.BlockSpec((D, GW), lambda i: (0, 0)),          # fused W_ih (bf16)
            pl.BlockSpec((1, GW), lambda i: (0, 0)),          # folded b_ih (+ r/z b_hh)
            pl.BlockSpec((GP, GW), lambda i: (0, 0)),         # block-diag W_hh (bf16)
            pl.BlockSpec((1, GP), lambda i: (0, 0)),          # n-gate b_hh
            pl.BlockSpec((GP, TSP), lambda i: (0, 0)),        # fused head weight (bf16)
            pl.BlockSpec((1, TSP), lambda i: (0, 0)),         # padded head bias (-1e30 pads)
        ],
        out_specs=pl.BlockSpec((bt, S), lambda i: (i, 0)),
        scratch_shapes=[
            pltpu.VMEM((S, bt, GW), jnp.bfloat16),   # fused input-gate projections
            pltpu.VMEM((S, bt, GP), jnp.float32),    # [h_fwd | h_bwd] hidden states
        ],
        compiler_params=pltpu.CompilerParams(
            dimension_semantics=("parallel",),
            vmem_limit_bytes=vmem_limit,
        ),
    )(x, wih, bih, whh, bhn, wts, bts)

    return out[:B]                                                            # (B, S) int32


def init_params(key):
    ks = jax.random.split(key, 11)
    u = lambda k, shape: jax.random.uniform(k, shape, jnp.float32, -0.1, 0.1)
    return {
        # GRU forward direction (weights stored pre-transposed: x @ W), gate order r,z,n
        "wih_f": u(ks[0], (DIM_IN, 3 * DIM_H)),
        "whh_f": u(ks[1], (DIM_H, 3 * DIM_H)),
        "bih_f": u(ks[2], (1, 3 * DIM_H)),
        "bhh_f": u(ks[3], (1, 3 * DIM_H)),
        # GRU backward direction
        "wih_b": u(ks[4], (DIM_IN, 3 * DIM_H)),
        "whh_b": u(ks[5], (DIM_H, 3 * DIM_H)),
        "bih_b": u(ks[6], (1, 3 * DIM_H)),
        "bhh_b": u(ks[7], (1, 3 * DIM_H)),
        # head split into fwd/bwd halves of the (TS, 2H) PyTorch weight
        "wts_f": u(ks[8], (DIM_H, DIM_TS)),
        "wts_b": u(ks[9], (DIM_H, DIM_TS)),
        "bts": u(ks[10], (1, DIM_TS)),
    }


def reference_forward(sequence_output, p):
    """Pure-JAX reference mirroring the kernel's math/precision (bf16 weights and
    gi rounding, f32 gate math and carry). Returns (labels, top-2 logit margin)."""
    B, S, D = sequence_output.shape
    H = DIM_H
    f32, bf16 = jnp.float32, jnp.bfloat16
    x = jnp.transpose(sequence_output, (1, 0, 2)).astype(bf16)                # (S, B, D)

    def run_dir(wih, whh, bih, bhh, reverse):
        xs = x[::-1] if reverse else x
        b_fold = bih + jnp.concatenate([bhh[:, :2 * H], jnp.zeros((1, H), f32)], axis=1)
        gi = (jnp.einsum("sbd,dh->sbh", xs, wih.astype(bf16),
                         preferred_element_type=f32) + b_fold).astype(bf16).astype(f32)
        bhn = bhh[:, 2 * H:]
        whh16 = whh.astype(bf16)

        def step(h, gi_t):
            gh = jnp.dot(h.astype(bf16), whh16, preferred_element_type=f32)
            r = jax.nn.sigmoid(gi_t[:, :H] + gh[:, :H])
            z = jax.nn.sigmoid(gi_t[:, H:2 * H] + gh[:, H:2 * H])
            n = jnp.tanh(gi_t[:, 2 * H:] + r * (gh[:, 2 * H:] + bhn))
            h_new = n + z * (h - n)
            return h_new, h_new

        h0 = jnp.zeros((B, H), f32)
        _, hs = jax.lax.scan(step, h0, gi)                                    # (S, B, H)
        return hs[::-1] if reverse else hs

    hf = run_dir(p["wih_f"], p["whh_f"], p["bih_f"], p["bhh_f"], False)
    hb = run_dir(p["wih_b"], p["whh_b"], p["bih_b"], p["bhh_b"], True)
    h_cat = jnp.concatenate([hf, hb], axis=-1).astype(bf16).reshape(S * B, 2 * H)
    w_cat = jnp.concatenate([p["wts_f"], p["wts_b"]], axis=0).astype(bf16)
    logits = (jnp.dot(h_cat, w_cat, preferred_element_type=f32).reshape(S, B, DIM_TS)
              + p["bts"])
    labels = jnp.argmax(logits, axis=-1).astype(jnp.int32)                    # (S, B)
    srt = jnp.sort(logits, axis=-1)
    margin = srt[..., -1] - srt[..., -2]                                      # (S, B)
    return jnp.transpose(labels), jnp.transpose(margin)                       # (B, S) each


if __name__ == "__main__":
    key = jax.random.PRNGKey(0)
    k_x, k_p = jax.random.split(key)
    B, S = 2, 8

    # Stand-in for BERT's sequence_output (B, S, 768).
    sequence_output = jax.random.normal(k_x, (B, S, DIM_IN), jnp.float32)
    params = init_params(k_p)

    out = jax.jit(token_gru_head_forward)(sequence_output, params)
    out = jax.block_until_ready(out)

    ref_labels, ref_margin = reference_forward(sequence_output, params)
    assert out.shape == (B, S) and out.dtype == jnp.int32
    # Exact argmax agreement except at genuine near-ties (accumulation-order noise).
    ok = (out == ref_labels) | (ref_margin < 1e-2)
    assert bool(jnp.all(ok)), "Pallas kernel disagrees with JAX reference beyond tie tolerance"
    print("KERNEL_OK")
</pallas_src>

<mosaic_0001>
module attributes {stable_mosaic.version = 11 : i64} {
  func.func @_gru_head_kernel(%arg0: i32, %arg1: memref<8x8x768xbf16, #tpu.memory_space<vmem>>, %arg2: memref<768x384xbf16, #tpu.memory_space<vmem>>, %arg3: memref<1x384xf32, #tpu.memory_space<vmem>>, %arg4: memref<128x384xbf16, #tpu.memory_space<vmem>>, %arg5: memref<1x128xf32, #tpu.memory_space<vmem>>, %arg6: memref<128x128xbf16, #tpu.memory_space<vmem>>, %arg7: memref<1x128xf32, #tpu.memory_space<vmem>>, %arg8: memref<8x8xi32, #tpu.memory_space<vmem>>, %arg9: memref<8x8x384xbf16, #tpu.memory_space<vmem>>, %arg10: memref<8x8x128xf32, #tpu.memory_space<vmem>>) attributes {dimension_semantics = [#tpu.dimension_semantics<parallel>], iteration_bounds = array<i64: 1>, scalar_prefetch = 0 : i64, scratch_operands = 2 : i64, tpu.core_type = #tpu.core_type<tc>, window_params = [{transform_indices = @transform_0, window_bounds = array<i64: 8, 8, 768>}, {pipeline_mode = #tpu.pipeline_mode<synchronous>, transform_indices = @transform_1, window_bounds = array<i64: 768, 384>}, {pipeline_mode = #tpu.pipeline_mode<synchronous>, transform_indices = @transform_2, window_bounds = array<i64: 1, 384>}, {pipeline_mode = #tpu.pipeline_mode<synchronous>, transform_indices = @transform_3, window_bounds = array<i64: 128, 384>}, {pipeline_mode = #tpu.pipeline_mode<synchronous>, transform_indices = @transform_4, window_bounds = array<i64: 1, 128>}, {pipeline_mode = #tpu.pipeline_mode<synchronous>, transform_indices = @transform_5, window_bounds = array<i64: 128, 128>}, {pipeline_mode = #tpu.pipeline_mode<synchronous>, transform_indices = @transform_6, window_bounds = array<i64: 1, 128>}, {transform_indices = @transform_7, window_bounds = array<i64: 8, 8>}]} {
    %c0 = arith.constant 0 : index
    %c0_0 = arith.constant 0 : index
    %c0_1 = arith.constant 0 : index
    %0 = vector.load %arg1[%c0, %c0_0, %c0_1] : memref<8x8x768xbf16, #tpu.memory_space<vmem>>, vector<8x8x768xbf16>
    %1 = vector.shape_cast %0 : vector<8x8x768xbf16> to vector<64x768xbf16>
    %c0_2 = arith.constant 0 : index
    %c0_3 = arith.constant 0 : index
    %2 = vector.load %arg2[%c0_2, %c0_3] : memref<768x384xbf16, #tpu.memory_space<vmem>>, vector<768x384xbf16>
    %cst = arith.constant dense<0.000000e+00> : vector<64x384xf32>
    %3 = tpu.matmul %1, %2, %cst {dimension_numbers = #tpu.dot_dimension_numbers<[1], [0], [0], [1], [0, 0, 1, 1], [], []>} : vector<64x768xbf16>, vector<768x384xbf16>, vector<64x384xf32> -> vector<64x384xf32>
    %c0_4 = arith.constant 0 : index
    %c0_5 = arith.constant 0 : index
    %4 = vector.load %arg3[%c0_4, %c0_5] : memref<1x384xf32, #tpu.memory_space<vmem>>, vector<1x384xf32>
    %5 = vector.broadcast %4 : vector<1x384xf32> to vector<64x384xf32>
    %6 = arith.addf %3, %5 : vector<64x384xf32>
    %7 = vector.shape_cast %6 : vector<64x384xf32> to vector<8x8x384xf32>
    %8 = arith.truncf %7 : vector<8x8x384xf32> to vector<8x8x384xbf16>
    %c0_6 = arith.constant 0 : index
    %c0_7 = arith.constant 0 : index
    %c0_8 = arith.constant 0 : index
    %9 = vector.load %arg9[%c0_6, %c0_7, %c0_8] : memref<8x8x384xbf16, #tpu.memory_space<vmem>>, vector<8x8x384xbf16>
    tpu.vector_store %arg9[%c0_6, %c0_7, %c0_8], %8 {strides = array<i32>} : memref<8x8x384xbf16, #tpu.memory_space<vmem>>, vector<8x8x384xbf16>,
    %c0_9 = arith.constant 0 : index
    %c0_10 = arith.constant 0 : index
    %10 = vector.load %arg4[%c0_9, %c0_10] : memref<128x384xbf16, #tpu.memory_space<vmem>>, vector<128x384xbf16>
    %c0_11 = arith.constant 0 : index
    %c0_12 = arith.constant 0 : index
    %11 = vector.load %arg5[%c0_11, %c0_12] : memref<1x128xf32, #tpu.memory_space<vmem>>, vector<1x128xf32>
    %12 = vector.shape_cast %11 : vector<1x128xf32> to vector<1x128xf32>
    %13 = vector.broadcast %12 : vector<1x128xf32> to vector<8x128xf32>
    %14 = tpu.iota {dimensions = array<i32: 1>} : vector<8x384xi32>
    %c127_i32 = arith.constant 127 : i32
    %15 = vector.broadcast %c127_i32 : i32 to vector<8x384xi32>
    %16 = arith.andi %14, %15 : vector<8x384xi32>
    %c64_i32 = arith.constant 64 : i32
    %17 = vector.broadcast %c64_i32 : i32 to vector<8x384xi32>
    %18 = arith.cmpi slt, %16, %17 : vector<8x384xi32>
    %cst_13 = arith.constant 0.000000e+00 : f32
    %19 = vector.broadcast %cst_13 : f32 to vector<8x128xf32>
    %c0_i32 = arith.constant 0 : i32
    %c8_i32 = arith.constant 8 : i32
    %20 = arith.addi %c0_i32, %c8_i32 : i32
    %c1_i32 = arith.constant 1 : i32
    %21 = scf.for %arg11 = %c0_i32 to %20 step %c1_i32 iter_args(%arg12 = %19) -> (vector<8x128xf32>)  : i32 {
      %c7_i32 = arith.constant 7 : i32
      %41 = arith.subi %c7_i32, %arg11 : i32
      %42 = arith.index_cast %arg11 : i32 to index
      %c0_27 = arith.constant 0 : index
      %c0_28 = arith.constant 0 : index
      %43 = vector.load %arg9[%42, %c0_27, %c0_28] : memref<8x8x384xbf16, #tpu.memory_space<vmem>>, vector<1x8x384xbf16>
      %44 = vector.shape_cast %43 : vector<1x8x384xbf16> to vector<8x384xbf16>
      %45 = arith.index_cast %41 : i32 to index
      %c0_29 = arith.constant 0 : index
      %c0_30 = arith.constant 0 : index
      %46 = vector.load %arg9[%45, %c0_29, %c0_30] : memref<8x8x384xbf16, #tpu.memory_space<vmem>>, vector<1x8x384xbf16>
      %47 = vector.shape_cast %46 : vector<1x8x384xbf16> to vector<8x384xbf16>
      %48 = arith.select %18, %44, %47 : vector<8x384xi1>, vector<8x384xbf16>
      %49 = arith.extf %48 : vector<8x384xbf16> to vector<8x384xf32>
      %50 = arith.truncf %arg12 : vector<8x128xf32> to vector<8x128xbf16>
      %cst_31 = arith.constant dense<0.000000e+00> : vector<8x384xf32>
      %51 = tpu.matmul %50, %10, %cst_31 {dimension_numbers = #tpu.dot_dimension_numbers<[1], [0], [0], [1], [0, 0, 1, 1], [], []>} : vector<8x128xbf16>, vector<128x384xbf16>, vector<8x384xf32> -> vector<8x384xf32>
      %52 = vector.extract_strided_slice %49 {offsets = [0, 0], sizes = [8, 128], strides = [1, 1]} : vector<8x384xf32> to vector<8x128xf32>
      %53 = vector.extract_strided_slice %51 {offsets = [0, 0], sizes = [8, 128], strides = [1, 1]} : vector<8x384xf32> to vector<8x128xf32>
      %54 = arith.addf %52, %53 : vector<8x128xf32>
      %55 = arith.negf %54 : vector<8x128xf32>
      %56 = math.exp %55 : vector<8x128xf32>
      %cst_32 = arith.constant 1.000000e+00 : f32
      %57 = vector.broadcast %cst_32 : f32 to vector<8x128xf32>
      %58 = arith.addf %57, %56 : vector<8x128xf32>
      %59 = arith.divf %57, %58 : vector<8x128xf32>
      %60 = vector.extract_strided_slice %49 {offsets = [0, 128], sizes = [8, 128], strides = [1, 1]} : vector<8x384xf32> to vector<8x128xf32>
      %61 = vector.extract_strided_slice %51 {offsets = [0, 128], sizes = [8, 128], strides = [1, 1]} : vector<8x384xf32> to vector<8x128xf32>
      %62 = arith.addf %60, %61 : vector<8x128xf32>
      %63 = arith.negf %62 : vector<8x128xf32>
      %64 = math.exp %63 : vector<8x128xf32>
      %cst_33 = arith.constant 1.000000e+00 : f32
      %65 = vector.broadcast %cst_33 : f32 to vector<8x128xf32>
      %66 = arith.addf %65, %64 : vector<8x128xf32>
      %67 = arith.divf %65, %66 : vector<8x128xf32>
      %68 = vector.extract_strided_slice %49 {offsets = [0, 256], sizes = [8, 128], strides = [1, 1]} : vector<8x384xf32> to vector<8x128xf32>
      %69 = vector.extract_strided_slice %51 {offsets = [0, 256], sizes = [8, 128], strides = [1, 1]} : vector<8x384xf32> to vector<8x128xf32>
      %70 = arith.addf %69, %13 : vector<8x128xf32>
      %71 = arith.mulf %59, %70 : vector<8x128xf32>
      %72 = arith.addf %68, %71 : vector<8x128xf32>
      %73 = math.tanh %72 : vector<8x128xf32>
      %74 = arith.subf %arg12, %73 : vector<8x128xf32>
      %75 = arith.mulf %67, %74 : vector<8x128xf32>
      %76 = arith.addf %73, %75 : vector<8x128xf32>
      %77 = vector.extract_strided_slice %76 {offsets = [0, 0], sizes = [8, 64], strides = [1, 1]} : vector<8x128xf32> to vector<8x64xf32>
      %78 = arith.index_cast %arg11 : i32 to index
      %c0_34 = arith.constant 0 : index
      %c0_35 = arith.constant 0 : index
      %79 = vector.load %arg10[%78, %c0_34, %c0_35] : memref<8x8x128xf32, #tpu.memory_space<vmem>>, vector<1x8x64xf32>
      %80 = vector.shape_cast %79 : vector<1x8x64xf32> to vector<8x64xf32>
      %81 = vector.shape_cast %77 : vector<8x64xf32> to vector<1x8x64xf32>
      tpu.vector_store %arg10[%78, %c0_34, %c0_35], %81 {strides = array<i32>} : memref<8x8x128xf32, #tpu.memory_space<vmem>>, vector<1x8x64xf32>,
      %82 = vector.extract_strided_slice %76 {offsets = [0, 64], sizes = [8, 64], strides = [1, 1]} : vector<8x128xf32> to vector<8x64xf32>
      %83 = arith.index_cast %41 : i32 to index
      %c0_36 = arith.constant 0 : index
      %c64 = arith.constant 64 : index
      %84 = vector.load %arg10[%83, %c0_36, %c64] : memref<8x8x128xf32, #tpu.memory_space<vmem>>, vector<1x8x64xf32>
      %85 = vector.shape_cast %84 : vector<1x8x64xf32> to vector<8x64xf32>
      %86 = vector.shape_cast %82 : vector<8x64xf32> to vector<1x8x64xf32>
      tpu.vector_store %arg10[%83, %c0_36, %c64], %86 {strides = array<i32>} : memref<8x8x128xf32, #tpu.memory_space<vmem>>, vector<1x8x64xf32>,
      scf.yield %76 : vector<8x128xf32>
    }
    %c8_i32_14 = arith.constant 8 : i32
    %c0_15 = arith.constant 0 : index
    %c0_16 = arith.constant 0 : index
    %c0_17 = arith.constant 0 : index
    %22 = vector.load %arg10[%c0_15, %c0_16, %c0_17] : memref<8x8x128xf32, #tpu.memory_space<vmem>>, vector<8x8x128xf32>
    %23 = vector.shape_cast %22 : vector<8x8x128xf32> to vector<64x128xf32>
    %24 = arith.truncf %23 : vector<64x128xf32> to vector<64x128xbf16>
    %c0_18 = arith.constant 0 : index
    %c0_19 = arith.constant 0 : index
    %25 = vector.load %arg6[%c0_18, %c0_19] : memref<128x128xbf16, #tpu.memory_space<vmem>>, vector<128x128xbf16>
    %cst_20 = arith.constant dense<0.000000e+00> : vector<64x128xf32>
    %26 = tpu.matmul %24, %25, %cst_20 {dimension_numbers = #tpu.dot_dimension_numbers<[1], [0], [0], [1], [0, 0, 1, 1], [], []>} : vector<64x128xbf16>, vector<128x128xbf16>, vector<64x128xf32> -> vector<64x128xf32>
    %c0_21 = arith.constant 0 : index
    %c0_22 = arith.constant 0 : index
    %27 = vector.load %arg7[%c0_21, %c0_22] : memref<1x128xf32, #tpu.memory_space<vmem>>, vector<1x128xf32>
    %28 = vector.broadcast %27 : vector<1x128xf32> to vector<64x128xf32>
    %29 = arith.addf %26, %28 : vector<64x128xf32>
    %30 = vector.shape_cast %29 : vector<64x128xf32> to vector<8x8x128xf32>
    %cst_23 = arith.constant dense<0xFF800000> : vector<8x8xf32>
    %31 = vector.multi_reduction <maximumf>, %30, %cst_23 [2] : vector<8x8x128xf32> to vector<8x8xf32>
    %32 = vector.shape_cast %31 : vector<8x8xf32> to vector<8x8x1xf32>
    %33 = tpu.iota {dimensions = array<i32: 2>} : vector<8x8x128xi32>
    %34 = vector.broadcast %32 : vector<8x8x1xf32> to vector<8x8x128xf32>
    %35 = arith.cmpf oge, %30, %34 : vector<8x8x128xf32>
    %c128_i32 = arith.constant 128 : i32
    %36 = vector.broadcast %c128_i32 : i32 to vector<8x8x128xi32>
    %37 = arith.select %35, %33, %36 : vector<8x8x128xi1>, vector<8x8x128xi32>
    %cst_24 = arith.constant dense<2147483647> : vector<8x8xi32>
    %38 = vector.multi_reduction <minsi>, %37, %cst_24 [2] : vector<8x8x128xi32> to vector<8x8xi32>
    %39 = tpu.transpose %38, [1, 0] : vector<8x8xi32> -> vector<8x8xi32>
    %c0_25 = arith.constant 0 : index
    %c0_26 = arith.constant 0 : index
    %40 = vector.load %arg8[%c0_25, %c0_26] : memref<8x8xi32, #tpu.memory_space<vmem>>, vector<8x8xi32>
    tpu.vector_store %arg8[%c0_25, %c0_26], %39 {strides = array<i32>} : memref<8x8xi32, #tpu.memory_space<vmem>>, vector<8x8xi32>,
    return
  }
  func.func @transform_0(%arg0: i32) -> (i32, i32, i32) {
    %c0_i32 = arith.constant 0 : i32
    %c0_i32_0 = arith.constant 0 : i32
    %c0_i32_1 = arith.constant 0 : i32
    return %c0_i32, %arg0, %c0_i32_0 : i32, i32, i32
  }
  func.func @transform_1(%arg0: i32) -> (i32, i32) {
    %c0_i32 = arith.constant 0 : i32
    %c0_i32_0 = arith.constant 0 : i32
    %c0_i32_1 = arith.constant 0 : i32
    return %c0_i32, %c0_i32_0 : i32, i32
  }
  func.func @transform_2(%arg0: i32) -> (i32, i32) {
    %c0_i32 = arith.constant 0 : i32
    %c0_i32_0 = arith.constant 0 : i32
    %c0_i32_1 = arith.constant 0 : i32
    return %c0_i32, %c0_i32_0 : i32, i32
  }
  func.func @transform_3(%arg0: i32) -> (i32, i32) {
    %c0_i32 = arith.constant 0 : i32
    %c0_i32_0 = arith.constant 0 : i32
    %c0_i32_1 = arith.constant 0 : i32
    return %c0_i32, %c0_i32_0 : i32, i32
  }
  func.func @transform_4(%arg0: i32) -> (i32, i32) {
    %c0_i32 = arith.constant 0 : i32
    %c0_i32_0 = arith.constant 0 : i32
    %c0_i32_1 = arith.constant 0 : i32
    return %c0_i32, %c0_i32_0 : i32, i32
  }
  func.func @transform_5(%arg0: i32) -> (i32, i32) {
    %c0_i32 = arith.constant 0 : i32
    %c0_i32_0 = arith.constant 0 : i32
    %c0_i32_1 = arith.constant 0 : i32
    return %c0_i32, %c0_i32_0 : i32, i32
  }
  func.func @transform_6(%arg0: i32) -> (i32, i32) {
    %c0_i32 = arith.constant 0 : i32
    %c0_i32_0 = arith.constant 0 : i32
    %c0_i32_1 = arith.constant 0 : i32
    return %c0_i32, %c0_i32_0 : i32, i32
  }
  func.func @transform_7(%arg0: i32) -> (i32, i32) {
    %c0_i32 = arith.constant 0 : i32
    %c0_i32_0 = arith.constant 0 : i32
    return %arg0, %c0_i32 : i32, i32
  }
}

</mosaic_0001>

<bundles_post_ra>
// kernel: token_gru_head_forward.1
= control target key start
LH: loop header
LB: loop body
LE: loop exit
PB: predicated region body
PF: predicated region fallthrough
CT: control target
= control target key end

     0   :  { %s4238_s1 = inlined_call_operand.vmem [shape: bf16[768,384], index: 1, kind: input, shape index: {}]   ;;  %s4239_s5 = inlined_call_operand.vmem [shape: bf16[128,128], index: 5, kind: input, shape index: {}]   ;;  %s4240_s6 = inlined_call_operand.vmem [shape: f32[1,128], index: 6, kind: input, shape index: {}]   ;;  %s4241_s7 = inlined_call_operand.vmem [shape: s32[8,8], index: 7, kind: output, shape index: {}]   ;;  %s4242_s0 = inlined_call_operand.vmem [shape: bf16[8,8,768], index: 0, kind: input, shape index: {}]   ;;  %s4243_s3 = inlined_call_operand.vmem [shape: bf16[128,384], index: 3, kind: input, shape index: {}]   ;;  %s4244_s4 = inlined_call_operand.vmem [shape: f32[1,128], index: 4, kind: input, shape index: {}]   ;;  %s4245_s2 = inlined_call_operand.vmem [shape: f32[1,384], index: 2, kind: input, shape index: {}]  }
   0x1   :  { %v2866_v0 = vld [vmem:[%s4238_s1 + $0xac] ss:$12 sps:$4 sm:$0xff]   ;;  %v2870_v2 = vld [vmem:[%s4238_s1 + $0xa8] ss:$12 sps:$4 sm:$0xff]   ;;  %v2876_v6 = vld [vmem:[%s4238_s1 + $0x90] ss:$12 sps:$4 sm:$0xff]  }
   0x2   :  { %v2868_v1 = vld [vmem:[%s4238_s1 + $0x22c] ss:$12 sps:$4 sm:$0xff]   ;;  %1148 = vmatprep.subr.bf16.mxu0 %v2866_v0  ;;  %v2871_v3 = vld [vmem:[%s4238_s1 + $0x228] ss:$12 sps:$4 sm:$0xff]   ;;  %v2877_v7 = vld [vmem:[%s4238_s1 + $0x210] ss:$12 sps:$4 sm:$0xff]  }
   0x3   :  { %1221 = vmatprep.subr.bf16.mxu1 %v2868_v1  ;;  %v2872_v4 = vld [vmem:[%s4238_s1 + $0x94] ss:$12 sps:$4 sm:$0xff]   ;;  %1149 = vmatpush1.bf16.msra.mxu0 %v2870_v2  ;;  %v2878_v8 = vld [vmem:[%s4238_s1 + $0x7c] ss:$12 sps:$4 sm:$0xff]   ;;  %v2882_v10 = vld [vmem:[%s4238_s1 + $0x78] ss:$12 sps:$4 sm:$0xff]  }
   0x4   :  { %1222 = vmatpush1.bf16.msra.mxu1 %v2871_v3  ;;  %v2874_v5 = vld [vmem:[%s4238_s1 + $0x214] ss:$12 sps:$4 sm:$0xff]   ;;  %1150 = vmatprep.subr.bf16.mxu0 %v2872_v4  ;;  %v2880_v9 = vld [vmem:[%s4238_s1 + $0x1fc] ss:$12 sps:$4 sm:$0xff]   ;;  %v2883_v11 = vld [vmem:[%s4238_s1 + $0x1f8] ss:$12 sps:$4 sm:$0xff]  }
   0x5   :  { %1223 = vmatprep.subr.bf16.mxu1 %v2874_v5  ;;  %v2884_v12 = vld [vmem:[%s4238_s1 + $0x64] ss:$12 sps:$4 sm:$0xff]   ;;  %v2888_v14 = vld [vmem:[%s4238_s1 + $0x60] ss:$12 sps:$4 sm:$0xff]   ;;  %v2894_v18 = vld [vmem:[%s4238_s1 + $0x48] ss:$12 sps:$4 sm:$0xff]  }
   0x6   :  { %v2886_v13 = vld [vmem:[%s4238_s1 + $0x1e4] ss:$12 sps:$4 sm:$0xff]   ;;  %v2889_v15 = vld [vmem:[%s4238_s1 + $0x1e0] ss:$12 sps:$4 sm:$0xff]   ;;  %v2895_v19 = vld [vmem:[%s4238_s1 + $0x1c8] ss:$12 sps:$4 sm:$0xff]  }
   0x7   :  { %1151 = vmatpush1.bf16.msra.mxu0 %v2876_v6  ;;  %v2890_v16 = vld [vmem:[%s4238_s1 + $0x4c] ss:$12 sps:$4 sm:$0xff]   ;;  %v2896_v20 = vld [vmem:[%s4238_s1 + $0x34] ss:$12 sps:$4 sm:$0xff]   ;;  %v2900_v22 = vld [vmem:[%s4238_s1 + $0x30] ss:$12 sps:$4 sm:$0xff]  }
   0x8   :  { %1224 = vmatpush1.bf16.msra.mxu1 %v2877_v7  ;;  %1152 = vmatprep.subr.bf16.mxu0 %v2878_v8  ;;  %v2892_v17 = vld [vmem:[%s4238_s1 + $0x1cc] ss:$12 sps:$4 sm:$0xff]   ;;  %v2898_v21 = vld [vmem:[%s4238_s1 + $0x1b4] ss:$12 sps:$4 sm:$0xff]   ;;  %v2901_v23 = vld [vmem:[%s4238_s1 + $0x1b0] ss:$12 sps:$4 sm:$0xff]  }
   0x9   :  { %1225 = vmatprep.subr.bf16.mxu1 %v2880_v9  ;;  %v2902_v24 = vld [vmem:[%s4238_s1 + $0x1c] ss:$12 sps:$4 sm:$0xff]   ;;  %v2906_v26 = vld [vmem:[%s4238_s1 + $0x18] ss:$12 sps:$4 sm:$0xff]   ;;  %v2912_v30 = vld [vmem:[%s4238_s1] ss:$12 sps:$4 sm:$0xff]  }
   0xa   :  { %v2904_v25 = vld [vmem:[%s4238_s1 + $0x19c] ss:$12 sps:$4 sm:$0xff]   ;;  %v2907_v27 = vld [vmem:[%s4238_s1 + $0x198] ss:$12 sps:$4 sm:$0xff]   ;;  %v2913_v31 = vld [vmem:[%s4238_s1 + $0x180] ss:$12 sps:$4 sm:$0xff]  }
   0xb   :  { %1153 = vmatpush1.bf16.msra.mxu0 %v2882_v10  ;;  %v2908_v28 = vld [vmem:[%s4238_s1 + $0x4] ss:$12 sps:$4 sm:$0xff]   ;;  %v2914_v32 = vld [vmem:[%s4238_s1 + $0x16c] ss:$12 sps:$4 sm:$0xff]   ;;  %v2918_v34 = vld [vmem:[%s4238_s1 + $0x168] ss:$12 sps:$4 sm:$0xff]  }
   0xc   :  { %1226 = vmatpush1.bf16.msra.mxu1 %v2883_v11  ;;  %1154 = vmatprep.subr.bf16.mxu0 %v2884_v12  ;;  %v2910_v29 = vld [vmem:[%s4238_s1 + $0x184] ss:$12 sps:$4 sm:$0xff]   ;;  %v2916_v33 = vld [vmem:[%s4238_s1 + $0x2ec] ss:$12 sps:$4 sm:$0xff]   ;;  %v2919_v35 = vld [vmem:[%s4238_s1 + $0x2e8] ss:$12 sps:$4 sm:$0xff]  }
   0xd   :  { %1227 = vmatprep.subr.bf16.mxu1 %v2886_v13  ;;  %v2920_v36 = vld [vmem:[%s4238_s1 + $0x154] ss:$12 sps:$4 sm:$0xff]   ;;  %v2924_v38 = vld [vmem:[%s4238_s1 + $0x150] ss:$12 sps:$4 sm:$0xff]   ;;  %v2930_v42 = vld [vmem:[%s4238_s1 + $0x138] ss:$12 sps:$4 sm:$0xff]  }
   0xe   :  { %v2922_v37 = vld [vmem:[%s4238_s1 + $0x2d4] ss:$12 sps:$4 sm:$0xff]   ;;  %v2925_v39 = vld [vmem:[%s4238_s1 + $0x2d0] ss:$12 sps:$4 sm:$0xff]   ;;  %v2931_v43 = vld [vmem:[%s4238_s1 + $0x2b8] ss:$12 sps:$4 sm:$0xff]  }
   0xf   :  { %1155 = vmatpush1.bf16.msra.mxu0 %v2888_v14  ;;  %v2926_v40 = vld [vmem:[%s4238_s1 + $0x13c] ss:$12 sps:$4 sm:$0xff]   ;;  %v2932_v44 = vld [vmem:[%s4238_s1 + $0x124] ss:$12 sps:$4 sm:$0xff]   ;;  %v2936_v46 = vld [vmem:[%s4238_s1 + $0x120] ss:$12 sps:$4 sm:$0xff]  }
  0x10   :  { %1228 = vmatpush1.bf16.msra.mxu1 %v2889_v15  ;;  %1156 = vmatprep.subr.bf16.mxu0 %v2890_v16  ;;  %v2928_v41 = vld [vmem:[%s4238_s1 + $0x2bc] ss:$12 sps:$4 sm:$0xff]   ;;  %v2934_v45 = vld [vmem:[%s4238_s1 + $0x2a4] ss:$12 sps:$4 sm:$0xff]   ;;  %v2937_v47 = vld [vmem:[%s4238_s1 + $0x2a0] ss:$12 sps:$4 sm:$0xff]  }
  0x11   :  { %1229 = vmatprep.subr.bf16.mxu1 %v2892_v17  ;;  %v2938_v48 = vld [vmem:[%s4238_s1 + $0x10c] ss:$12 sps:$4 sm:$0xff]   ;;  %v3321_v49 = vld [vmem:[%s4242_s0 + $0x4] ss:$24 sps:$4 sm:$0xff]   ;;  %v2942_v52 = vld [vmem:[%s4238_s1 + $0x108] ss:$12 sps:$4 sm:$0xff]  }
  0x12   :  { %v2940_v50 = vld [vmem:[%s4238_s1 + $0x28c] ss:$12 sps:$4 sm:$0xff]   ;;  %1180 = vmatprep.mubr.bf16.mxu0 %v3321_v49  ;;  %v2943_v53 = vld [vmem:[%s4238_s1 + $0x288] ss:$12 sps:$4 sm:$0xff]   ;;  %v2948_v56 = vld [vmem:[%s4238_s1 + $0xf0] ss:$12 sps:$4 sm:$0xff]  }
  0x13   :  { %1157 = vmatpush1.bf16.msra.mxu0 %v2894_v18  ;;  %v3329_v51 = vld [vmem:[%s4242_s0 + $0xc] ss:$24 sps:$4 sm:$0xff]   ;;  %v2944_v54 = vld [vmem:[%s4238_s1 + $0xf4] ss:$12 sps:$4 sm:$0xff]   ;;  %v2949_v57 = vld [vmem:[%s4238_s1 + $0x270] ss:$12 sps:$4 sm:$0xff]  }
  0x14   :  { %1230 = vmatpush1.bf16.msra.mxu1 %v2895_v19  ;;  %1158 = vmatprep.subr.bf16.mxu0 %v2896_v20  ;;  %v2946_v55 = vld [vmem:[%s4238_s1 + $0x274] ss:$12 sps:$4 sm:$0xff]   ;;  %v2950_v58 = vld [vmem:[%s4238_s1 + $0xdc] ss:$12 sps:$4 sm:$0xff]   ;;  %v2954_v60 = vld [vmem:[%s4238_s1 + $0xd8] ss:$12 sps:$4 sm:$0xff]  }
  0x15   :  { %1231 = vmatprep.subr.bf16.mxu1 %v2898_v21  ;;  %1253 = vmatprep.mubr.bf16.mxu1 %v3329_v51  ;;  %v2952_v59 = vld [vmem:[%s4238_s1 + $0x25c] ss:$12 sps:$4 sm:$0xff]   ;;  %v2955_v61 = vld [vmem:[%s4238_s1 + $0x258] ss:$12 sps:$4 sm:$0xff]   ;;  %v2960_v0 = vld [vmem:[%s4238_s1 + $0xc0] ss:$12 sps:$4 sm:$0xff]  }
  0x16   :  { %v2956_v62 = vld [vmem:[%s4238_s1 + $0xc4] ss:$12 sps:$4 sm:$0xff]   ;;  %v2961_v1 = vld [vmem:[%s4238_s1 + $0x240] ss:$12 sps:$4 sm:$0xff]   ;;  %v2968_v6 = vld [vmem:[%s4238_s1 + $0x3a8] ss:$12 sps:$4 sm:$0xff]  }
  0x17   :  { %1159 = vmatpush1.bf16.msra.mxu0 %v2900_v22  ;;  %v2958_v63 = vld [vmem:[%s4238_s1 + $0x244] ss:$12 sps:$4 sm:$0xff]   ;;  %v2970_v2 = vld [vmem:[%s4238_s1 + $0x3ac] ss:$12 sps:$4 sm:$0xff]   ;;  %v3389_v5 = vld [vmem:[%s4242_s0 + $0x8] ss:$24 sps:$4 sm:$0xff]  }
  0x18   :  { %1232 = vmatpush1.bf16.msra.mxu1 %v2901_v23  ;;  %1160 = vmatprep.subr.bf16.mxu0 %v2902_v24  ;;  %v3381_v3 = vld [vmem:[%s4242_s0] ss:$24 sps:$4 sm:$0xff]   ;;  %v2971_v4 = vld [vmem:[%s4238_s1 + $0x170] ss:$12 sps:$4 sm:$0xff]   ;;  %v3406_v10 = vld [vmem:[%s4242_s0 + $0x34] ss:$24 sps:$4 sm:$0xff]  }
  0x19   :  { %1233 = vmatprep.subr.bf16.mxu1 %v2904_v25  ;;  %v2972_v7 = vld [vmem:[%s4238_s1 + $0xb0] ss:$12 sps:$4 sm:$0xff]   ;;  %v2975_v8 = vld [vmem:[%s4238_s1 + $0x394] ss:$12 sps:$4 sm:$0xff]   ;;  %v2976_v9 = vld [vmem:[%s4238_s1 + $0x158] ss:$12 sps:$4 sm:$0xff]  }
  0x1a   :  { %v3411_v11 = vld [vmem:[%s4242_s0 + $0x3c] ss:$24 sps:$4 sm:$0xff]   ;;  %v2977_v13 = vld [vmem:[%s4238_s1 + $0x98] ss:$12 sps:$4 sm:$0xff]   ;;  %v3427_v15 = vld [vmem:[%s4242_s0 + $0x30] ss:$24 sps:$4 sm:$0xff]  }
  0x1b   :  { %1161 = vmatpush1.bf16.msra.mxu0 %v2906_v26  ;;  %v2973_v12 = vld [vmem:[%s4238_s1 + $0x390] ss:$12 sps:$4 sm:$0xff]   ;;  %v2987_v16 = vld [vmem:[%s4238_s1 + $0x140] ss:$12 sps:$4 sm:$0xff]   ;;  %v2984_v18 = vld [vmem:[%s4238_s1 + $0x378] ss:$12 sps:$4 sm:$0xff]  }
  0x1c   :  { %1234 = vmatpush1.bf16.msra.mxu1 %v2907_v27  ;;  %1162 = vmatprep.subr.bf16.mxu0 %v2908_v28  ;;  %v2986_v14 = vld [vmem:[%s4238_s1 + $0x37c] ss:$12 sps:$4 sm:$0xff]   ;;  %v3437_v17 = vld [vmem:[%s4242_s0 + $0x38] ss:$24 sps:$4 sm:$0xff]   ;;  %v2988_v19 = vld [vmem:[%s4238_s1 + $0x80] ss:$12 sps:$4 sm:$0xff]  }
  0x1d   :  { %1235 = vmatprep.subr.bf16.mxu1 %v2910_v29  ;;  %v2991_v20 = vld [vmem:[%s4238_s1 + $0x364] ss:$12 sps:$4 sm:$0xff]   ;;  %v2992_v21 = vld [vmem:[%s4238_s1 + $0x128] ss:$12 sps:$4 sm:$0xff]   ;;  %v2989_v24 = vld [vmem:[%s4238_s1 + $0x360] ss:$12 sps:$4 sm:$0xff]  }
  0x1e   :  { %v3454_v22 = vld [vmem:[%s4242_s0 + $0x64] ss:$24 sps:$4 sm:$0xff]   ;;  %v2993_v25 = vld [vmem:[%s4238_s1 + $0x68] ss:$12 sps:$4 sm:$0xff]   ;;  %v3472_v26 = vld [vmem:[%s4242_s0 + $0x60] ss:$24 sps:$4 sm:$0xff]  }
  0x1f   :  { %1163 = vmatpush1.bf16.msra.mxu0 %v2912_v30  ;;  %v3459_v23 = vld [vmem:[%s4242_s0 + $0x6c] ss:$24 sps:$4 sm:$0xff]   ;;  %v3477_v27 = vld [vmem:[%s4242_s0 + $0x68] ss:$24 sps:$4 sm:$0xff]   ;;  %v3003_v29 = vld [vmem:[%s4238_s1 + $0x110] ss:$12 sps:$4 sm:$0xff]  }
  0x20   :  { %1236 = vmatpush1.bf16.msra.mxu1 %v2913_v31  ;;  %1164 = vmatprep.subr.bf16.mxu0 %v2914_v32  ;;  %v3002_v28 = vld [vmem:[%s4238_s1 + $0x34c] ss:$12 sps:$4 sm:$0xff]   ;;  %v3000_v30 = vld [vmem:[%s4238_s1 + $0x348] ss:$12 sps:$4 sm:$0xff]   ;;  %v3004_v31 = vld [vmem:[%s4238_s1 + $0x50] ss:$12 sps:$4 sm:$0xff]  }
  0x21   :  { %1237 = vmatprep.subr.bf16.mxu1 %v2916_v33  ;;  %v3007_v32 = vld [vmem:[%s4238_s1 + $0x334] ss:$12 sps:$4 sm:$0xff]   ;;  %v3008_v33 = vld [vmem:[%s4238_s1 + $0xf8] ss:$12 sps:$4 sm:$0xff]  }
  0x23   :  { %1165 = vmatpush2.bf16.msra.mxu0 %v2918_v34  ;;  %v3502_v34 = vld [vmem:[%s4242_s0 + $0x94] ss:$24 sps:$4 sm:$0xff]  }
  0x24   :  { %1238 = vmatpush2.bf16.msra.mxu1 %v2919_v35  ;;  %1166 = vmatprep.subr.bf16.mxu0 %v2920_v36  ;;  %v3507_v35 = vld [vmem:[%s4242_s0 + $0x9c] ss:$24 sps:$4 sm:$0xff]  }
  0x25   :  { %1239 = vmatprep.subr.bf16.mxu1 %v2922_v37  ;;  %v3005_v36 = vld [vmem:[%s4238_s1 + $0x330] ss:$12 sps:$4 sm:$0xff]   ;;  %v3009_v37 = vld [vmem:[%s4238_s1 + $0x38] ss:$12 sps:$4 sm:$0xff]  }
  0x27   :  { %1167 = vmatpush2.bf16.msra.mxu0 %v2924_v38  ;;  %v3018_v38 = vld [vmem:[%s4238_s1 + $0x31c] ss:$12 sps:$4 sm:$0xff]  }
  0x28   :  { %1240 = vmatpush2.bf16.msra.mxu1 %v2925_v39  ;;  %1168 = vmatprep.subr.bf16.mxu0 %v2926_v40  ;;  %v3523_v39 = vld [vmem:[%s4242_s0 + $0x90] ss:$24 sps:$4 sm:$0xff]   ;;  %v3019_v40 = vld [vmem:[%s4238_s1 + $0xe0] ss:$12 sps:$4 sm:$0xff]  }
  0x29   :  { %1241 = vmatprep.subr.bf16.mxu1 %v2928_v41  ;;  %v3533_v41 = vld [vmem:[%s4242_s0 + $0x98] ss:$24 sps:$4 sm:$0xff]  }
  0x2b   :  { %1169 = vmatpush2.bf16.msra.mxu0 %v2930_v42  ;;  %v3016_v42 = vld [vmem:[%s4238_s1 + $0x318] ss:$12 sps:$4 sm:$0xff]  }
  0x2c   :  { %1242 = vmatpush2.bf16.msra.mxu1 %v2931_v43  ;;  %1170 = vmatprep.subr.bf16.mxu0 %v2932_v44  ;;  %v3020_v43 = vld [vmem:[%s4238_s1 + $0x20] ss:$12 sps:$4 sm:$0xff]   ;;  %v3023_v44 = vld [vmem:[%s4238_s1 + $0x304] ss:$12 sps:$4 sm:$0xff]  }
  0x2d   :  { %1243 = vmatprep.subr.bf16.mxu1 %v2934_v45  ;;  %v3024_v45 = vld [vmem:[%s4238_s1 + $0xc8] ss:$12 sps:$4 sm:$0xff]  }
  0x2f   :  { %1171 = vmatpush2.bf16.msra.mxu0 %v2936_v46  ;;  %v3021_v46 = vld [vmem:[%s4238_s1 + $0x300] ss:$12 sps:$4 sm:$0xff]  }
  0x30   :  { %1244 = vmatpush2.bf16.msra.mxu1 %v2937_v47  ;;  %1172 = vmatprep.subr.bf16.mxu0 %v2938_v48  ;;  %v3025_v47 = vld [vmem:[%s4238_s1 + $0x8] ss:$12 sps:$4 sm:$0xff]   ;;  %v3028_v48 = vld [vmem:[%s4238_s1 + $0x46c] ss:$12 sps:$4 sm:$0xff]  }
  0x31   :  { %1245 = vmatprep.subr.bf16.mxu1 %v2940_v50  ;;  %v3029_v50 = vld [vmem:[%s4238_s1 + $0x2f0] ss:$12 sps:$4 sm:$0xff]  }
  0x33   :  { %1173 = vmatpush2.bf16.msra.mxu0 %v2942_v52  ;;  %v3026_v52 = vld [vmem:[%s4238_s1 + $0x468] ss:$12 sps:$4 sm:$0xff]  }
  0x34   :  { %1246 = vmatpush2.bf16.msra.mxu1 %v2943_v53  ;;  %1174 = vmatprep.subr.bf16.mxu0 %v2944_v54  ;;  %v3030_v53 = vld [vmem:[%s4238_s1 + $0x230] ss:$12 sps:$4 sm:$0xff]   ;;  %v3033_v54 = vld [vmem:[%s4238_s1 + $0x454] ss:$12 sps:$4 sm:$0xff]  }
  0x35   :  { %1247 = vmatprep.subr.bf16.mxu1 %v2946_v55  ;;  %v3031_v55 = vld [vmem:[%s4238_s1 + $0x450] ss:$12 sps:$4 sm:$0xff]  }
  0x37   :  { %1175 = vmatpush2.bf16.msra.mxu0 %v2948_v56  ;;  %v3035_v56 = vld [vmem:[%s4238_s1 + $0x218] ss:$12 sps:$4 sm:$0xff]  }
  0x38   :  { %1248 = vmatpush2.bf16.msra.mxu1 %v2949_v57  ;;  %1176 = vmatprep.subr.bf16.mxu0 %v2950_v58  ;;  %v3038_v57 = vld [vmem:[%s4238_s1 + $0x43c] ss:$12 sps:$4 sm:$0xff]   ;;  %v3039_v58 = vld [vmem:[%s4238_s1 + $0x2c0] ss:$12 sps:$4 sm:$0xff]  }
  0x39   :  { %1249 = vmatprep.subr.bf16.mxu1 %v2952_v59  ;;  %v3036_v59 = vld [vmem:[%s4238_s1 + $0x438] ss:$12 sps:$4 sm:$0xff]  }
  0x3b   :  { %1177 = vmatpush2.bf16.msra.mxu0 %v2954_v60  ;;  %v3040_v60 = vld [vmem:[%s4238_s1 + $0x200] ss:$12 sps:$4 sm:$0xff]  }
  0x3c   :  { %1250 = vmatpush2.bf16.msra.mxu1 %v2955_v61  ;;  %1178 = vmatprep.subr.bf16.mxu0 %v2956_v62  ;;  %v3043_v61 = vld [vmem:[%s4238_s1 + $0x424] ss:$12 sps:$4 sm:$0xff]   ;;  %v3044_v62 = vld [vmem:[%s4238_s1 + $0x2a8] ss:$12 sps:$4 sm:$0xff]  }
  0x3d   :  { %1251 = vmatprep.subr.bf16.mxu1 %v2958_v63  ;;  %v3041_v63 = vld [vmem:[%s4238_s1 + $0x420] ss:$12 sps:$4 sm:$0xff]  }
  0x3f   :  { %1179 = vmatpush2.bf16.msra.mxu0 %v2960_v0  ;;  %v3045_v0 = vld [vmem:[%s4238_s1 + $0x1e8] ss:$12 sps:$4 sm:$0xff]  }
  0x40   :  { %1252 = vmatpush2.bf16.msra.mxu1 %v2961_v1  ;;  %1294 = vmatprep.subr.bf16.mxu0 %v2970_v2  ;;  %v3610_v1 = vld [vmem:[%s4242_s0 + $0x14] ss:$24 sps:$4 sm:$0xff]  }
  0x41   :  { %2629 = vmatprep.subr.bf16.mxu1 %v2971_v4  ;;  %v3048_v2 = vld [vmem:[%s4238_s1 + $0x40c] ss:$12 sps:$4 sm:$0xff]   ;;  %v3046_v4 = vld [vmem:[%s4238_s1 + $0x408] ss:$12 sps:$4 sm:$0xff]  }
  0x42   :  { %1181 = vmatmul.mubr.bf16.vlgmr.msra.gmra.mxu0 %v3381_v3 }
  0x43   :  { %1254 = vmatmul.mubr.bf16.vlgmr.msra.gmra.mxu1 %v3389_v5  ;;  %1295 = vmatpush1.bf16.msra.mxu0 %v2968_v6  ;;  %v3050_v6 = vld [vmem:[%s4238_s1 + $0x1d0] ss:$12 sps:$4 sm:$0xff]  }
  0x44   :  { %2630 = vmatpush3.bf16.msra.mxu1 %v2972_v7  ;;  %1296 = vmatprep.subr.bf16.mxu0 %v2975_v8  ;;  %v3053_v7 = vld [vmem:[%s4238_s1 + $0x3f4] ss:$12 sps:$4 sm:$0xff]   ;;  %v3054_v8 = vld [vmem:[%s4238_s1 + $0x278] ss:$12 sps:$4 sm:$0xff]  }
  0x45   :  { %2631 = vmatprep.subr.bf16.mxu1 %v2976_v9  ;;  %1190 = vmatprep.mubr.bf16.mxu0 %v3406_v10  ;;  %v3051_v9 = vld [vmem:[%s4238_s1 + $0x3f0] ss:$12 sps:$4 sm:$0xff]  }
  0x46   :  { %1263 = vmatprep.mubr.bf16.mxu1 %v3411_v11 }
  0x47   :  { %1297 = vmatpush1.bf16.msra.mxu0 %v2973_v12  ;;  %v3058_v12 = vld [vmem:[%s4238_s1 + $0x3dc] ss:$12 sps:$4 sm:$0xff]  }
  0x48   :  { %2632 = vmatpush3.bf16.msra.mxu1 %v2977_v13  ;;  %1298 = vmatprep.subr.bf16.mxu0 %v2986_v14  ;;  %v3059_v13 = vld [vmem:[%s4238_s1 + $0x260] ss:$12 sps:$4 sm:$0xff]   ;;  %v3056_v14 = vld [vmem:[%s4238_s1 + $0x3d8] ss:$12 sps:$4 sm:$0xff]  }
  0x49   :  { %2633 = vmatprep.subr.bf16.mxu1 %v2987_v16  ;;  %v3063_v16 = vld [vmem:[%s4238_s1 + $0x3c4] ss:$12 sps:$4 sm:$0xff]  }
  0x4a   :  { %1191 = vmatmul.mubr.bf16.gmra.mxu0 %v3427_v15 }
  0x4b   :  { %1264 = vmatmul.mubr.bf16.gmra.mxu1 %v3437_v17  ;;  %1299 = vmatpush1.bf16.msra.mxu0 %v2984_v18  ;;  %v3064_v18 = vld [vmem:[%s4238_s1 + $0x248] ss:$12 sps:$4 sm:$0xff]  }
  0x4c   :  { %2634 = vmatpush3.bf16.msra.mxu1 %v2988_v19  ;;  %1300 = vmatprep.subr.bf16.mxu0 %v2991_v20  ;;  %v3061_v19 = vld [vmem:[%s4238_s1 + $0x3c0] ss:$12 sps:$4 sm:$0xff]   ;;  %v3065_v20 = vld [vmem:[%s4238_s1 + $0x188] ss:$12 sps:$4 sm:$0xff]  }
  0x4d   :  { %2635 = vmatprep.subr.bf16.mxu1 %v2992_v21  ;;  %1200 = vmatprep.mubr.bf16.mxu0 %v3454_v22  ;;  %v3069_v21 = vld [vmem:[%s4238_s1 + $0x470] ss:$12 sps:$4 sm:$0xff]  }
  0x4e   :  { %1273 = vmatprep.mubr.bf16.mxu1 %v3459_v23 }
  0x4f   :  { %1301 = vmatpush1.bf16.msra.mxu0 %v2989_v24  ;;  %v3070_v24 = vld [vmem:[%s4238_s1 + $0x3b0] ss:$12 sps:$4 sm:$0xff]  }
  0x50   :  { %2636 = vmatpush3.bf16.msra.mxu1 %v2993_v25  ;;  %1302 = vmatprep.subr.bf16.mxu0 %v3002_v28  ;;  %v3071_v25 = vld [vmem:[%s4238_s1 + $0x458] ss:$12 sps:$4 sm:$0xff]   ;;  %v3076_v28 = vld [vmem:[%s4238_s1 + $0x440] ss:$12 sps:$4 sm:$0xff]  }
  0x51   :  { %2637 = vmatprep.subr.bf16.mxu1 %v3003_v29  ;;  %v3077_v29 = vld [vmem:[%s4238_s1 + $0x380] ss:$12 sps:$4 sm:$0xff]  }
  0x52   :  { %1201 = vmatmul.mubr.bf16.gmra.mxu0 %v3472_v26 }
  0x53   :  { %1274 = vmatmul.mubr.bf16.gmra.mxu1 %v3477_v27  ;;  %1303 = vmatpush1.bf16.msra.mxu0 %v3000_v30  ;;  %v3078_v30 = vld [vmem:[%s4238_s1 + $0x428] ss:$12 sps:$4 sm:$0xff]  }
  0x54   :  { %2638 = vmatpush3.bf16.msra.mxu1 %v3004_v31  ;;  %1304 = vmatprep.subr.bf16.mxu0 %v3007_v32  ;;  %v3079_v31 = vld [vmem:[%s4238_s1 + $0x368] ss:$12 sps:$4 sm:$0xff]   ;;  %v3083_v32 = vld [vmem:[%s4238_s1 + $0x410] ss:$12 sps:$4 sm:$0xff]  }
  0x55   :  { %2639 = vmatprep.subr.bf16.mxu1 %v3008_v33  ;;  %1210 = vmatprep.mubr.bf16.mxu0 %v3502_v34  ;;  %v4246_v33 = vlaneseq }
  0x56   :  { %1283 = vmatprep.mubr.bf16.mxu1 %v3507_v35 }
  0x57   :  { %1305 = vmatpush1.bf16.msra.mxu0 %v3005_v36  ;;  %v3725_v36 = vand.u32 127, %v4246_v33 }
  0x58   :  { %2640 = vmatpush3.bf16.msra.mxu1 %v3009_v37  ;;  %1306 = vmatprep.subr.bf16.mxu0 %v3018_v38  ;;  %v3087_v37 = vld [vmem:[%s4242_s0 + $0xa4] ss:$24 sps:$4 sm:$0xff]  }
  0x59   :  { %2641 = vmatprep.subr.bf16.mxu1 %v3019_v40  ;;  %4267 = vst [vmem:[#allocation4_spill] sm:$0xff] %v3725_v36  ;;  %v1723_v38 = vadd.s32 128, %v3725_v36  ;;  %vm1728_vm0 = vcmp.lt.s32.totalorder %v3725_v36, 64  ;;  %v3086_v40 = vld [vmem:[%s4238_s1 + $0x338] ss:$12 sps:$4 sm:$0xff]  }
  0x5a   :  { %1211 = vmatmul.mubr.bf16.gmra.mxu0 %v3523_v39 }
  0x5b   :  { %1284 = vmatmul.mubr.bf16.gmra.mxu1 %v3533_v41  ;;  %1307 = vmatpush1.bf16.msra.mxu0 %v3016_v42  ;;  %v1726_v42 = vand.u32 127, %v1723_v38 }
  0x5c   :  { %2642 = vmatpush3.bf16.msra.mxu1 %v3020_v43  ;;  %1308 = vmatprep.subr.bf16.mxu0 %v3023_v44  ;;  %v3090_v44 = vld [vmem:[%s4238_s1 + $0x3e0] ss:$12 sps:$4 sm:$0xff]  }
  0x5d   :  { %2643 = vmatprep.subr.bf16.mxu1 %v3024_v45  ;;  %1399 = vmatprep.mubr.bf16.mxu1 %v3321_v49  ;;  %v3034_v49 = vld [vmem:[%s4238_s1 + $0x2d8] ss:$12 sps:$4 sm:$0xff]   ;;  %vm3744_vm1 = vcmp.lt.s32.totalorder %v1726_v42, 64  ;;  %v4268_v45 = vmov 0 }
  0x5e   :  { %1326 = vmatprep.mubr.bf16.mxu0 %v3610_v1  ;;  %v4269_v45 = vsel %vm3744_vm1, 4294967295, %v4268_v45 }
  0x5f   :  { %1309 = vmatpush1.bf16.msra.mxu0 %v3021_v46  ;;  %4270 = vst [vmem:[#allocation5_spill] sm:$0xff] %v4269_v45  ;;  %v3089_v46 = vld [vmem:[%s4242_s0 + $0xa0] ss:$24 sps:$4 sm:$0xff]  }
  0x60   :  { %2644 = vmatpush3.bf16.msra.mxu1 %v3025_v47  ;;  %1310 = vmatprep.subr.bf16.mxu0 %v3028_v48  ;;  %v3091_v47 = vld [vmem:[%s4238_s1 + $0x320] ss:$12 sps:$4 sm:$0xff]   ;;  %v3093_v48 = vld [vmem:[%s4238_s1 + $0x308] ss:$12 sps:$4 sm:$0xff]  }
  0x61   :  { %2669 = vmatprep.subr.bf16.mxu1 %v3029_v50  ;;  %v3777_v50 = vld [vmem:[%s4243_s3 + $0x8] sm:$0xf] }
  0x62   :  { %4275 = vst [vmem:[#allocation8_spill] sm:$0xff] %v3777_v50 }
  0x63   :  { %1400 = vmatmul.mubr.bf16.vlgmr.msra.gmra.mxu1 %v3381_v3  ;;  %1311 = vmatpush2.bf16.msra.mxu0 %v3026_v52  ;;  %v3049_v3 = vld [vmem:[%s4238_s1 + $0x290] ss:$12 sps:$4 sm:$0xff]  }
  0x64   :  { %2670 = vmatpush3.bf16.msra.mxu1 %v3030_v53  ;;  %1312 = vmatprep.subr.bf16.mxu0 %v3033_v54  ;;  %v3782_v52 = vld [vmem:[%s4243_s3 + $0xc] sm:$0xff]  ;;  %v3787_v53 = vld [vmem:[%s4243_s3 + $0x14] sm:$0xf]  ;;  %v3792_v54 = vld [vmem:[%s4243_s3 + $0x18] sm:$0xff] }
  0x65   :  { %2671 = vmatprep.subr.bf16.mxu1 %v3034_v49  ;;  %1407 = vmatprep.mubr.bf16.mxu1 %v3406_v10  ;;  %v3055_v10 = vld [vmem:[%s4238_s1 + $0x1b8] ss:$12 sps:$4 sm:$0xff]   ;;  %4276 = vst [vmem:[#allocation9_spill] sm:$0xff] %v3782_v52  ;;  %4277 = vst [vmem:[#allocation10_spill] sm:$0xff] %v3787_v53  ;;  %v3797_v49 = vld [vmem:[%s4243_s3 + $0x20] sm:$0xf]  ;;  %v4308_v52 = vlaneseq }
  0x66   :  { %4278 = vst [vmem:[#allocation11_spill] sm:$0xff] %v3792_v54  ;;  %4279 = vst [vmem:[#allocation12_spill] sm:$0xff] %v3797_v49 }
  0x67   :  { %1313 = vmatpush2.bf16.msra.mxu0 %v3031_v55  ;;  %v3802_v55 = vld [vmem:[%s4243_s3 + $0x24] sm:$0xff] }
  0x68   :  { %2672 = vmatpush3.bf16.msra.mxu1 %v3035_v56  ;;  %1314 = vmatprep.subr.bf16.mxu0 %v3038_v57  ;;  %4280 = vst [vmem:[#allocation13_spill] sm:$0xff] %v3802_v55  ;;  %v3807_v56 = vld [vmem:[%s4243_s3 + $0x2c] sm:$0xf]  ;;  %v3812_v57 = vld [vmem:[%s4243_s3 + $0x30] sm:$0xff] }
  0x69   :  { %2673 = vmatprep.subr.bf16.mxu1 %v3039_v58  ;;  %4281 = vst [vmem:[#allocation14_spill] sm:$0xff] %v3807_v56  ;;  %4282 = vst [vmem:[#allocation15_spill] sm:$0xff] %v3812_v57  ;;  %v3817_v58 = vld [vmem:[%s4243_s3 + $0x38] sm:$0xf]  ;;  %v4002_v57 = vld [vmem:[%s4245_s2] sm:$0x7] }
  0x6a   :  { %4283 = vst [vmem:[#allocation16_spill] sm:$0xff] %v3817_v58  ;;  %v3989_v58 = vshrl.u32 %v4308_v52, 7  ;;  %s4118_s2 = smov 0  }
  0x6b   :  { %1408 = vmatmul.mubr.bf16.gmra.mxu1 %v3427_v15  ;;  %1315 = vmatpush2.bf16.msra.mxu0 %v3036_v59  ;;  %v3060_v15 = vld [vmem:[%s4238_s1 + $0x1a0] ss:$12 sps:$4 sm:$0xff]  }
  0x6c   :  { %2674 = vmatpush3.bf16.msra.mxu1 %v3040_v60  ;;  %1316 = vmatprep.subr.bf16.mxu0 %v3043_v61  ;;  %v3822_v59 = vld [vmem:[%s4243_s3 + $0x3c] sm:$0xff]  ;;  %v3827_v60 = vld [vmem:[%s4243_s3 + $0x44] sm:$0xf]  ;;  %v3832_v61 = vld [vmem:[%s4243_s3 + $0x48] sm:$0xff] }
  0x6d   :  { %2675 = vmatprep.subr.bf16.mxu1 %v3044_v62  ;;  %1415 = vmatprep.mubr.bf16.mxu1 %v3454_v22  ;;  %v3672_v22 = vld [vmem:[%s4242_s0 + $0x10] ss:$24 sps:$4 sm:$0xff]   ;;  %4284 = vst [vmem:[#allocation17_spill] sm:$0xff] %v3822_v59  ;;  %4285 = vst [vmem:[#allocation18_spill] sm:$0xff] %v3827_v60 }
  0x6e   :  { %4286 = vst [vmem:[#allocation19_spill] sm:$0xff] %v3832_v61  ;;  %v3837_v62 = vld [vmem:[%s4243_s3 + $0x50] sm:$0xf] }
  0x6f   :  { %1317 = vmatpush2.bf16.msra.mxu0 %v3041_v63  ;;  %4287 = vst [vmem:[#allocation20_spill] sm:$0xff] %v3837_v62  ;;  %v3842_v63 = vld [vmem:[%s4243_s3 + $0x54] sm:$0xff]  ;;  %v247_v62 = vsub.s32 0, %v3989_v58 }
  0x70   :  { %2676 = vmatpush3.bf16.msra.mxu1 %v3045_v0  ;;  %1318 = vmatprep.subr.bf16.mxu0 %v3048_v2  ;;  %4288 = vst [vmem:[#allocation21_spill] sm:$0xff] %v3842_v63  ;;  %v3847_v0 = vld [vmem:[%s4243_s3 + $0x5c] sm:$0xf]  ;;  %v3857_v2 = vld [vmem:[%s4243_s3 + $0x68] sm:$0xf] }
  0x71   :  { %2677 = vmatprep.subr.bf16.mxu1 %v3049_v3  ;;  %4289 = vst [vmem:[#allocation22_spill] sm:$0xff] %v3847_v0  ;;  %4291 = vst [vmem:[#allocation24_spill] sm:$0xff] %v3857_v2  ;;  %v3862_v3 = vld [vmem:[%s4243_s3 + $0x6c] sm:$0xff]  ;;  %v251_v0 = vsub.s32 1, %v3989_v58 }
  0x72   :  { %4292 = vst [vmem:[#allocation25_spill] sm:$0xff] %v3862_v3 }
  0x73   :  { %1416 = vmatmul.mubr.bf16.gmra.mxu1 %v3472_v26  ;;  %1319 = vmatpush2.bf16.msra.mxu0 %v3046_v4  ;;  %v3072_v26 = vld [vmem:[%s4238_s1 + $0x398] ss:$12 sps:$4 sm:$0xff]   ;;  %v3867_v4 = vld [vmem:[%s4243_s3 + $0x74] sm:$0xf]  ;;  %v4014_v61 = vrot.slane %v4002_v57, %v251_v0 }
  0x74   :  { %2678 = vmatpush3.bf16.msra.mxu1 %v3050_v6  ;;  %1320 = vmatprep.subr.bf16.mxu0 %v3053_v7  ;;  %4293 = vst [vmem:[#allocation26_spill] sm:$0xff] %v3867_v4  ;;  %v3872_v6 = vld [vmem:[%s4243_s3 + $0x78] sm:$0xff]  ;;  %v3877_v7 = vld [vmem:[%s4243_s3 + $0x80] sm:$0xf]  ;;  %v4011_v4 = vrot.slane %v4002_v57, %v247_v62 }
  0x75   :  { %2679 = vmatprep.subr.bf16.mxu1 %v3054_v8  ;;  %1423 = vmatprep.mubr.bf16.mxu1 %v3502_v34  ;;  %v3084_v34 = vld [vmem:[%s4238_s1 + $0x350] ss:$12 sps:$4 sm:$0xff]   ;;  %4294 = vst [vmem:[#allocation27_spill] sm:$0xff] %v3872_v6  ;;  %4295 = vst [vmem:[#allocation28_spill] sm:$0xff] %v3877_v7  ;;  %v3882_v8 = vld [vmem:[%s4243_s3 + $0x84] sm:$0xff] }
  0x76   :  { %4296 = vst [vmem:[#allocation29_spill] sm:$0xff] %v3882_v8 }
  0x77   :  { %1321 = vmatpush2.bf16.msra.mxu0 %v3051_v9  ;;  %v3887_v9 = vld [vmem:[%s4243_s3 + $0x8c] sm:$0xf] }
  0x78   :  { %2680 = vmatpush3.bf16.msra.mxu1 %v3055_v10  ;;  %1322 = vmatprep.subr.bf16.mxu0 %v3058_v12  ;;  %4297 = vst [vmem:[#allocation30_spill] sm:$0xff] %v3887_v9  ;;  %v3892_v10 = vld [vmem:[%s4243_s3 + $0x90] sm:$0xff]  ;;  %v3897_v12 = vld [vmem:[%s4243_s3 + $0x98] sm:$0xf] }
  0x79   :  { %2681 = vmatprep.subr.bf16.mxu1 %v3059_v13  ;;  %4298 = vst [vmem:[#allocation31_spill] sm:$0xff] %v3892_v10  ;;  %4299 = vst [vmem:[#allocation32_spill] sm:$0xff] %v3897_v12  ;;  %v3902_v13 = vld [vmem:[%s4243_s3 + $0x9c] sm:$0xff] }
  0x7a   :  { %4300 = vst [vmem:[#allocation33_spill] sm:$0xff] %v3902_v13 }
  0x7b   :  { %1424 = vmatmul.mubr.bf16.gmra.mxu1 %v3523_v39  ;;  %1323 = vmatpush2.bf16.msra.mxu0 %v3056_v14  ;;  %v1724_v39 = vadd.s32 256, %v3725_v36  ;;  %v3907_v14 = vld [vmem:[%s4243_s3 + $0xa4] sm:$0xf] }
  0x7c   :  { %2682 = vmatpush3.bf16.msra.mxu1 %v3060_v15  ;;  %1324 = vmatprep.subr.bf16.mxu0 %v3063_v16  ;;  %4301 = vst [vmem:[#allocation34_spill] sm:$0xff] %v3907_v14  ;;  %v3912_v15 = vld [vmem:[%s4243_s3 + $0xa8] sm:$0xff]  ;;  %v3917_v16 = vld [vmem:[%s4243_s3 + $0xb0] sm:$0xf] }
  0x7d   :  { %2683 = vmatprep.subr.bf16.mxu1 %v3064_v18  ;;  %1464 = vmatprep.mubr.bf16.mxu1 %v3329_v51  ;;  %v3683_v51 = vld [vmem:[%s4242_s0 + $0x44] ss:$24 sps:$4 sm:$0xff]   ;;  %v1727_v43 = vand.u32 127, %v1724_v39  ;;  %4302 = vst [vmem:[#allocation35_spill] sm:$0xff] %v3912_v15  ;;  %4303 = vst [vmem:[#allocation36_spill] sm:$0xff] %v3917_v16  ;;  %v3922_v18 = vld [vmem:[%s4243_s3 + $0xb4] sm:$0xff] }
  0x7e   :  { %4304 = vst [vmem:[#allocation37_spill] sm:$0xff] %v3922_v18 }
  0x7f   :  { %1325 = vmatpush2.bf16.msra.mxu0 %v3061_v19  ;;  %vm3748_vm2 = vcmp.lt.s32.totalorder %v1727_v43, 64  ;;  %v3927_v19 = vld [vmem:[%s4243_s3 + $0xbc] sm:$0xf] }
  0x80   :  { %2684 = vmatpush3.bf16.msra.mxu1 %v3065_v20  ;;  %2709 = vmatprep.subr.bf16.mxu0 %v3069_v21  ;;  %4305 = vst [vmem:[#allocation38_spill] sm:$0xff] %v3927_v19  ;;  %v3932_v20 = vld [vmem:[%s4244_s4] ss:$0 sm:$0xff] }
  0x81   :  { %2814 = vmatprep.subr.bf16.mxu1 %v3069_v21  ;;  %4306 = vst [vmem:[#allocation39_spill] sm:$0xff] %v3932_v20 }
  0x82   :  { %1327 = vmatmul.mubr.bf16.vlgmr.msra.gmra.mxu0 %v3672_v22 }
  0x83   :  { %1465 = vmatmul.mubr.bf16.vlgmr.msra.gmra.mxu1 %v3389_v5  ;;  %2710 = vmatpush3.bf16.msra.mxu0 %v3070_v24  ;;  %v3698_v5 = vld [vmem:[%s4242_s0 + $0x40] ss:$24 sps:$4 sm:$0xff]  }
  0x84   :  { %2822 = vmatpush3.bf16.msra.mxu1 %v3070_v24  ;;  %2711 = vmatprep.subr.bf16.mxu0 %v3071_v25 }
  0x85   :  { %2815 = vmatprep.subr.bf16.mxu1 %v3071_v25  ;;  %1336 = vmatprep.mubr.bf16.mxu0 %v3683_v51 }
  0x86   :  { %1472 = vmatprep.mubr.bf16.mxu1 %v3411_v11  ;;  %v3080_v11 = vld [vmem:[%s4242_s0 + $0x74] ss:$24 sps:$4 sm:$0xff]  }
  0x87   :  { %2712 = vmatpush3.bf16.msra.mxu0 %v3072_v26 }
  0x88   :  { %2823 = vmatpush3.bf16.msra.mxu1 %v3072_v26  ;;  %2713 = vmatprep.subr.bf16.mxu0 %v3076_v28 }
  0x89   :  { %2816 = vmatprep.subr.bf16.mxu1 %v3076_v28 }
  0x8a   :  { %1337 = vmatmul.mubr.bf16.gmra.mxu0 %v3698_v5 }
  0x8b   :  { %1473 = vmatmul.mubr.bf16.gmra.mxu1 %v3437_v17  ;;  %2714 = vmatpush3.bf16.msra.mxu0 %v3077_v29  ;;  %v3082_v17 = vld [vmem:[%s4242_s0 + $0x70] ss:$24 sps:$4 sm:$0xff]  }
  0x8c   :  { %2824 = vmatpush3.bf16.msra.mxu1 %v3077_v29  ;;  %2715 = vmatprep.subr.bf16.mxu0 %v3078_v30 }
  0x8d   :  { %2817 = vmatprep.subr.bf16.mxu1 %v3078_v30  ;;  %1346 = vmatprep.mubr.bf16.mxu0 %v3080_v11 }
  0x8e   :  { %1480 = vmatprep.mubr.bf16.mxu1 %v3459_v23  ;;  %v3085_v23 = vld [vmem:[%s4238_s1 + $0x3f8] ss:$12 sps:$4 sm:$0xff]  }
  0x8f   :  { %2716 = vmatpush3.bf16.msra.mxu0 %v3079_v31 }
  0x90   :  { %2825 = vmatpush3.bf16.msra.mxu1 %v3079_v31  ;;  %2717 = vmatprep.subr.bf16.mxu0 %v3083_v32 }
  0x91   :  { %2818 = vmatprep.subr.bf16.mxu1 %v3083_v32 }
  0x92   :  { %1347 = vmatmul.mubr.bf16.gmra.mxu0 %v3082_v17 }
  0x93   :  { %1481 = vmatmul.mubr.bf16.gmra.mxu1 %v3477_v27  ;;  %2718 = vmatpush3.bf16.msra.mxu0 %v3084_v34  ;;  %v4271_v27 = vmov 0 }
  0x94   :  { %2826 = vmatpush3.bf16.msra.mxu1 %v3084_v34  ;;  %2719 = vmatprep.subr.bf16.mxu0 %v3085_v23  ;;  %v4272_v27 = vsel %vm3748_vm2, 4294967295, %v4271_v27 }
  0x95   :  { %2819 = vmatprep.subr.bf16.mxu1 %v3085_v23  ;;  %1356 = vmatprep.mubr.bf16.mxu0 %v3087_v37  ;;  %4273 = vst [vmem:[#allocation6_spill] sm:$0xff] %v4272_v27 }
  0x96   :  { %1488 = vmatprep.mubr.bf16.mxu1 %v3507_v35  ;;  %v3092_v35 = vld [vmem:[%s4238_s1 + $0x3c8] ss:$12 sps:$4 sm:$0xff]  }
  0x97   :  { %2720 = vmatpush3.bf16.msra.mxu0 %v3086_v40 }
  0x98   :  { %2827 = vmatpush3.bf16.msra.mxu1 %v3086_v40  ;;  %2721 = vmatprep.subr.bf16.mxu0 %v3090_v44 }
  0x99   :  { %2820 = vmatprep.subr.bf16.mxu1 %v3090_v44 }
  0x9a   :  { %1357 = vmatmul.mubr.bf16.gmra.mxu0 %v3089_v46 }
  0x9b   :  { %1489 = vmatmul.mubr.bf16.gmra.mxu1 %v3533_v41  ;;  %2722 = vmatpush3.bf16.msra.mxu0 %v3091_v47  ;;  %v3772_v41 = vld [vmem:[%s4243_s3] sm:$0xff] }
  0x9c   :  { %2828 = vmatpush3.bf16.msra.mxu1 %v3091_v47  ;;  %2723 = vmatprep.subr.bf16.mxu0 %v3092_v35  ;;  %4274 = vst [vmem:[#allocation7_spill] sm:$0xff] %v3772_v41 }
  0x9d   :  { %2821 = vmatprep.subr.bf16.mxu1 %v3092_v35  ;;  %1529 = vmatprep.mubr.bf16.mxu0 %v3610_v1  ;;  %v3852_v1 = vld [vmem:[%s4243_s3 + $0x60] sm:$0xff] }
  0x9e   :  { %1545 = vmatprep.mubr.bf16.mxu1 %v3080_v11  ;;  %4290 = vst [vmem:[#allocation23_spill] sm:$0xff] %v3852_v1 }
  0x9f   :  { %2724 = vmatpush3.bf16.msra.mxu0 %v3093_v48 }
  0xa0   :  { %2829 = vmatpush3.bf16.msra.mxu1 %v3093_v48 }
  0xa2   :  { %1530 = vmatmul.mubr.bf16.vlgmr.msra.gmra.mxu0 %v3672_v22 }
  0xa3   :  { %1546 = vmatmul.mubr.bf16.vlgmr.msra.gmra.mxu1 %v3082_v17  ;;  %1537 = vmatprep.mubr.bf16.mxu0 %v3683_v51 }
  0xa4   :  { %1553 = vmatprep.mubr.bf16.mxu1 %v3087_v37 }
  0xaa   :  { %1538 = vmatmul.mubr.bf16.gmra.mxu0 %v3698_v5 }
  0xab   :  { %1554 = vmatmul.mubr.bf16.gmra.mxu1 %v3089_v46 }
 0x102   :  { %v1182_v22 = vpop.f32.mrf.mxu0 }
 0x103   :  { %v1255_v21 = vpop.f32.mrf.mxu1  ;;  %v1183_v1 = vadd.f32 %v1182_v22, %v4011_v4 }
 0x104   :  { %v1184_v51 = vpop.f32.mrf.mxu0 }
 0x105   :  { %v1257_v24 = vpop.f32.mrf.mxu1  ;;  %v1185_v3 = vadd.f32 %v1184_v51, %v4014_v61  ;;  %v1256_v0 = vadd.f32 %v1255_v21, %v1183_v1 }
 0x106   :  { %v1186_v5 = vpop.f32.mrf.mxu0 }
 0x107   :  { %v3934_v25 = vpop.f32.mrf.mxu1  ;;  %v1187_v62 = vadd.f32 %v1186_v5, %v4011_v4  ;;  %v1258_v16 = vadd.f32 %v1257_v24, %v1185_v3 }
 0x108   :  { %v1188_v11 = vpop.f32.mrf.mxu0 }
 0x109   :  { %v3936_v26 = vpop.f32.mrf.mxu1  ;;  %v1189_v19 = vadd.f32 %v1188_v11, %v4014_v61  ;;  %v1260_v51 = vadd.f32 %v3934_v25, %v1187_v62 }
 0x10a   :  { %v1192_v17 = vpop.f32.mrf.mxu0 }
 0x10b   :  { %v3938_v28 = vpop.f32.mrf.mxu1  ;;  %v1193_v5 = vadd.f32 %v1192_v17, %v4011_v4 }
 0x10c   :  { %v1194_v37 = vpop.f32.mrf.mxu0 }
 0x10d   :  { %v3940_v29 = vpop.f32.mrf.mxu1  ;;  %v1266_v25 = vadd.f32 %v3938_v28, %v1193_v5 }
 0x10e   :  { %v1196_v40 = vpop.f32.mrf.mxu0 }
 0x10f   :  { %v3942_v30 = vpop.f32.mrf.mxu1 }
 0x110   :  { %v1198_v44 = vpop.f32.mrf.mxu0 }
 0x111   :  { %v3944_v31 = vpop.f32.mrf.mxu1 }
 0x112   :  { %v3964_v35 = vpop.f32.mrf.mxu0 }
 0x113   :  { %v3946_v32 = vpop.f32.mrf.mxu1  ;;  %v1203_v28 = vadd.f32 %v3964_v35, %v4011_v4 }
 0x114   :  { %v3970_v20 = vpop.f32.mrf.mxu0 }
 0x115   :  { %v3948_v34 = vpop.f32.mrf.mxu1 }
 0x116   :  { %v3976_v36 = vpop.f32.mrf.mxu0 }
 0x117   :  { %v3950_v23 = vpop.f32.mrf.mxu1 }
 0x118   :  { %v3982_v49 = vpop.f32.mrf.mxu0 }
 0x119   :  { %v3952_v38 = vpop.f32.mrf.mxu1  ;;  %v1209_v35 = vadd.f32 %v3982_v49, %v4014_v61 }
 0x11a   :  { %v3991_v60 = vpop.f32.mrf.mxu0 }
 0x11b   :  { %v3954_v39 = vpop.f32.mrf.mxu1 }
 0x11c   :  { %v4004_v59 = vpop.f32.mrf.mxu0 }
 0x11d   :  { %v3956_v42 = vpop.f32.mrf.mxu1 }
 0x11e   :  { %v4016_v63 = vpop.f32.mrf.mxu0 }
 0x11f   :  { %v3958_v43 = vpop.f32.mrf.mxu1 }
 0x120   :  { %v4024_v12 = vpop.f32.mrf.mxu0 }
 0x121   :  { %v3960_v46 = vpop.f32.mrf.mxu1 }
 0x123   :  { %v3962_v47 = vpop.f32.mrf.mxu1 }
 0x125   :  { %v3966_v48 = vpop.f32.mrf.mxu1 }
 0x127   :  { %v3968_v33 = vpop.f32.mrf.mxu1 }
 0x129   :  { %v3972_v27 = vpop.f32.mrf.mxu1 }
 0x12b   :  { %v3974_v45 = vpop.f32.mrf.mxu1 }
 0x12d   :  { %v3978_v50 = vpop.f32.mrf.mxu1 }
 0x12f   :  { %v3980_v53 = vpop.f32.mrf.mxu1 }
 0x131   :  { %v3984_v56 = vpop.f32.mrf.mxu1 }
 0x132   :  { %4307 = vst [vmem:[#allocation40_spill] sm:$0xff] %v3984_v56  ;;  %v1195_v56 = vadd.f32 %v1194_v37, %v4014_v61 }
 0x133   :  { %v3986_v41 = vpop.f32.mrf.mxu1 }
 0x135   :  { %v3993_v54 = vpop.f32.mrf.mxu1 }
 0x137   :  { %v3995_v55 = vpop.f32.mrf.mxu1 }
 0x139   :  { %v4006_v2 = vpop.f32.mrf.mxu1 }
 0x13b   :  { %v4008_v52 = vpop.f32.mrf.mxu1 }
 0x13d   :  { %v4018_v7 = vpop.f32.mrf.mxu1 }
 0x13f   :  { %v4020_v9 = vpop.f32.mrf.mxu1 }
 0x140   :  { %4309 = vst [vmem:[#allocation41_spill] sm:$0xff] %v4020_v9 }
 0x141   :  { %v4026_v14 = vpop.f32.mrf.mxu1 }
 0x142   :  { %4310 = vst [vmem:[#allocation42_spill] sm:$0xff] %v4026_v14  ;;  %v1328_v6 = vpop.f32.mrf.mxu0  ;;  %v1262_v14 = vadd.f32 %v3936_v26, %v1189_v19  ;;  %v1268_v19 = vadd.f32 %v3940_v29, %v1195_v56  ;;  %v1199_v26 = vadd.f32 %v1198_v44, %v4014_v61  ;;  %v1205_v56 = vadd.f32 %v3970_v20, %v4014_v61 }
 0x143   :  { %v4029_v8 = vpop.f32.mrf.mxu1  ;;  %v1329_v15 = vadd.f32 %v1328_v6, %v1256_v0  ;;  %v1197_v6 = vadd.f32 %v1196_v40, %v4011_v4 }
 0x144   :  { %v1330_v10 = vpop.f32.mrf.mxu0 }
 0x145   :  { %v4032_v13 = vpop.f32.mrf.mxu1  ;;  %v1331_v22 = vadd.f32 %v1330_v10, %v1258_v16 }
 0x146   :  { %v1332_v18 = vpop.f32.mrf.mxu0 }
 0x147   :  { %v4035_v9 = vpop.f32.mrf.mxu1  ;;  %v2611_v1 = vpack.c.bf16 %v1331_v22, %v1329_v15  ;;  %v1333_v24 = vadd.f32 %v1332_v18, %v1260_v51  ;;  %v1272_v22 = vadd.f32 %v3944_v31, %v1199_v26  ;;  %v1276_v31 = vadd.f32 %v3946_v32, %v1203_v28 }
 0x148   :  { %v1334_v3 = vpop.f32.mrf.mxu0  ;;  %v1213_v32 = vadd.f32 %v3991_v60, %v4011_v4 }
 0x149   :  { %v4040_v21 = vpop.f32.mrf.mxu1  ;;  %1666 = vst [vmem:[#allocation2] sm:$0xff] %v2611_v1  ;;  %v1335_v11 = vadd.f32 %v1334_v3, %v1262_v14  ;;  %v1270_v14 = vadd.f32 %v3942_v30, %v1197_v6  ;;  %v1207_v30 = vadd.f32 %v3976_v36, %v4011_v4  ;;  %v1282_v36 = vadd.f32 %v3952_v38, %v1209_v35 }
 0x14a   :  { %v1338_v10 = vpop.f32.mrf.mxu0  ;;  %v1286_v38 = vadd.f32 %v3954_v39, %v1213_v32  ;;  %v2665_v32 = vadd.f32 %v4018_v7, %v4008_v52  ;;  %v4311_v7 = vld [vmem:[#allocation40_spill] sm:$0xff] }
 0x14b   :  { %v4043_v16 = vpop.f32.mrf.mxu1  ;;  %v2613_v17 = vpack.c.bf16 %v1335_v11, %v1333_v24  ;;  %v1339_v62 = vadd.f32 %v1338_v10, %v1266_v25  ;;  %v1278_v11 = vadd.f32 %v3948_v34, %v1205_v56  ;;  %v1280_v26 = vadd.f32 %v3950_v23, %v1207_v30 }
 0x14c   :  { %v1340_v37 = vpop.f32.mrf.mxu0  ;;  %v1215_v34 = vadd.f32 %v4004_v59, %v4014_v61  ;;  %v255_v23 = vsub.s32 2, %v3989_v58  ;;  %v1219_v59 = vadd.f32 %v4024_v12, %v4014_v61  ;;  %v2659_v61 = vadd.f32 %v3993_v54, %v3986_v41 }
 0x14d   :  { %v4048_v15 = vpop.f32.mrf.mxu1  ;;  %1668 = vst [vmem:[#allocation2 + $0xc] sm:$0xff] %v2613_v17  ;;  %v1341_v0 = vadd.f32 %v1340_v37, %v1268_v19  ;;  %v2656_v52 = vadd.f32 %v4311_v7, %v3980_v53 }
 0x14e   :  { %v1342_v18 = vpop.f32.mrf.mxu0  ;;  %v1288_v60 = vadd.f32 %v3956_v42, %v1215_v34  ;;  %v1292_v39 = vadd.f32 %v3960_v46, %v1219_v59  ;;  %v2647_v42 = vadd.f32 %v3966_v48, %v3962_v47  ;;  %v2662_v46 = vadd.f32 %v4006_v2, %v3995_v55  ;;  %v4312_v59 = vld [vmem:[#allocation41_spill] sm:$0xff] }
 0x14f   :  { %v4051_v40 = vpop.f32.mrf.mxu1  ;;  %v2615_v29 = vpack.c.bf16 %v1341_v0, %v1339_v62  ;;  %v1343_v5 = vadd.f32 %v1342_v18, %v1270_v14  ;;  %v2653_v2 = vadd.f32 %v3978_v50, %v3974_v45 }
 0x150   :  { %v1344_v44 = vpop.f32.mrf.mxu0 }
 0x151   :  { %v4058_v51 = vpop.f32.mrf.mxu1  ;;  %1670 = vst [vmem:[#allocation2 + $0x18] sm:$0xff] %v2615_v29  ;;  %v1345_v1 = vadd.f32 %v1344_v44, %v1272_v22  ;;  %v1217_v22 = vadd.f32 %v4016_v63, %v4011_v4  ;;  %v4081_v63 = vrot.slane %v4002_v57, %v255_v23 }
 0x152   :  { %v1348_v3 = vpop.f32.mrf.mxu0 }
 0x153   :  { %v2697_v24 = vpop.f32.mrf.mxu1  ;;  %v2617_v20 = vpack.c.bf16 %v1345_v1, %v1343_v5  ;;  %v1349_v25 = vadd.f32 %v1348_v3, %v1276_v31  ;;  %v1290_v3 = vadd.f32 %v3958_v43, %v1217_v22  ;;  %v1402_v41 = vadd.f32 %v2647_v42, %v4081_v63 }
 0x154   :  { %v1350_v6 = vpop.f32.mrf.mxu0  ;;  %v1418_v54 = vadd.f32 %v2659_v61, %v4081_v63 }
 0x155   :  { %v2698_v10 = vpop.f32.mrf.mxu1  ;;  %1672 = vst [vmem:[#allocation2 + $0x24] sm:$0xff] %v2617_v20  ;;  %v1351_v19 = vadd.f32 %v1350_v6, %v1278_v11  ;;  %v2687_v20 = vadd.f32 %v4032_v13, %v4029_v8  ;;  %v2690_v8 = vadd.f32 %v4040_v21, %v4035_v9 }
 0x156   :  { %v1352_v17 = vpop.f32.mrf.mxu0  ;;  %v2699_v43 = vadd.f32 %v2698_v10, %v2697_v24 }
 0x157   :  { %v2700_v37 = vpop.f32.mrf.mxu1  ;;  %v2619_v62 = vpack.c.bf16 %v1351_v19, %v1349_v25  ;;  %v1353_v14 = vadd.f32 %v1352_v17, %v1280_v26  ;;  %v2650_v25 = vadd.f32 %v3972_v27, %v3968_v33  ;;  %v1467_v26 = vadd.f32 %v2687_v20, %v1402_v41 }
 0x158   :  { %v1354_v49 = vpop.f32.mrf.mxu0  ;;  %v1483_v17 = vadd.f32 %v2699_v43, %v1418_v54  ;;  %v1413_v20 = vadd.f32 %v2656_v52, %v4081_v63 }
 0x159   :  { %v2701_v0 = vpop.f32.mrf.mxu1  ;;  %1674 = vst [vmem:[#allocation2 + $0x30] sm:$0xff] %v2619_v62  ;;  %v1355_v18 = vadd.f32 %v1354_v49, %v1282_v36  ;;  %v1405_v55 = vadd.f32 %v2650_v25, %v4081_v63  ;;  %v1421_v36 = vadd.f32 %v2662_v46, %v4081_v63  ;;  %v2693_v49 = vadd.f32 %v4048_v15, %v4043_v16 }
 0x15a   :  { %v1358_v28 = vpop.f32.mrf.mxu0  ;;  %v2702_v13 = vadd.f32 %v2701_v0, %v2700_v37 }
 0x15b   :  { %v2703_v56 = vpop.f32.mrf.mxu1  ;;  %v2621_v29 = vpack.c.bf16 %v1355_v18, %v1353_v14  ;;  %v1359_v1 = vadd.f32 %v1358_v28, %v1286_v38  ;;  %v1470_v62 = vadd.f32 %v2690_v8, %v1405_v55  ;;  %v1410_v38 = vadd.f32 %v2653_v2, %v4081_v63 }
 0x15c   :  { %v1360_v44 = vpop.f32.mrf.mxu0  ;;  %v1486_v0 = vadd.f32 %v2702_v13, %v1421_v36 }
 0x15d   :  { %v2704_v5 = vpop.f32.mrf.mxu1  ;;  %1676 = vst [vmem:[#allocation2 + $0x3c] sm:$0xff] %v2621_v29  ;;  %v1361_v30 = vadd.f32 %v1360_v44, %v1288_v60  ;;  %v1426_v60 = vadd.f32 %v2665_v32, %v4081_v63  ;;  %v4313_v29 = vld [vmem:[#allocation42_spill] sm:$0xff] }
 0x15e   :  { %v1362_v4 = vpop.f32.mrf.mxu0  ;;  %v2705_v14 = vadd.f32 %v2704_v5, %v2703_v56  ;;  %v2668_v44 = vadd.f32 %v4313_v29, %v4312_v59  ;;  %v1475_v5 = vadd.f32 %v2693_v49, %v1410_v38 }
 0x15f   :  { %v2706_v31 = vpop.f32.mrf.mxu1  ;;  %v2623_v12 = vpack.c.bf16 %v1361_v30, %v1359_v1  ;;  %v1363_v57 = vadd.f32 %v1362_v4, %v1290_v3  ;;  %v2696_v30 = vadd.f32 %v4058_v51, %v4051_v40 }
 0x160   :  { %v1364_v11 = vpop.f32.mrf.mxu0  ;;  %v1491_v3 = vadd.f32 %v2705_v14, %v1426_v60  ;;  %v1429_v43 = vadd.f32 %v2668_v44, %v4081_v63 }
 0x161   :  { %v2707_v35 = vpop.f32.mrf.mxu1  ;;  %1678 = vst [vmem:[#allocation2 + $0x48] sm:$0xff] %v2623_v12  ;;  %v1365_v6 = vadd.f32 %v1364_v11, %v1292_v39 }
 0x162   :  { %v2725_v47 = vpop.f32.mrf.mxu0  ;;  %v2708_v4 = vadd.f32 %v2707_v35, %v2706_v31 }
 0x163   :  { %v2737_v48 = vpop.f32.mrf.mxu1  ;;  %v2625_v19 = vpack.c.bf16 %v1365_v6, %v1363_v57 }
 0x164   :  { %v2726_v24 = vpop.f32.mrf.mxu0  ;;  %v1494_v40 = vadd.f32 %v2708_v4, %v1429_v43 }
 0x165   :  { %v2738_v10 = vpop.f32.mrf.mxu1  ;;  %1680 = vst [vmem:[#allocation2 + $0x54] sm:$0xff] %v2625_v19  ;;  %v2727_v33 = vadd.f32 %v2726_v24, %v2725_v47  ;;  %v1478_v47 = vadd.f32 %v2696_v30, %v1413_v20  ;;  %v4116_v24 = vmov 0.0  }
 0x166   :  { %v2739_v27 = vadd.f32 %v2738_v10, %v2737_v48  ;;  %v2728_v34 = vpop.f32.mrf.mxu0 }
 0x167   :  { %v2740_v9 = vpop.f32.mrf.mxu1  ;;  %v1532_v21 = vadd.f32 %v2727_v33, %v1467_v26 }
 0x168   :  { %v1548_v37 = vadd.f32 %v2739_v27, %v1483_v17  ;;  %v2729_v18 = vpop.f32.mrf.mxu0 }
 0x169   :  { %v2741_v22 = vpop.f32.mrf.mxu1  ;;  %v2612_v23 = vpack.c.bf16 %v1532_v21, %v1532_v21  ;;  %v2730_v45 = vadd.f32 %v2729_v18, %v2728_v34 }
 0x16a   :  { %v2620_v28 = vpack.c.bf16 %v1548_v37, %v1548_v37  ;;  %v2742_v50 = vadd.f32 %v2741_v22, %v2740_v9  ;;  %v2731_v1 = vpop.f32.mrf.mxu0 }
 0x16b   :  { %v2743_v16 = vpop.f32.mrf.mxu1  ;;  %1667 = vst [vmem:[#allocation2 + $0x8] sm:$0xf] %v2612_v23  ;;  %v1535_v15 = vadd.f32 %v2730_v45, %v1470_v62 }
 0x16c   :  { %1675 = vst [vmem:[#allocation2 + $0x38] sm:$0xf] %v2620_v28  ;;  %v1551_v56 = vadd.f32 %v2742_v50, %v1486_v0  ;;  %v2732_v39 = vpop.f32.mrf.mxu0 }
 0x16d   :  { %v2744_v42 = vpop.f32.mrf.mxu1  ;;  %v2614_v53 = vpack.c.bf16 %v1535_v15, %v1535_v15  ;;  %v2733_v12 = vadd.f32 %v2732_v39, %v2731_v1 }
 0x16e   :  { %v2622_v61 = vpack.c.bf16 %v1551_v56, %v1551_v56  ;;  %v2745_v11 = vadd.f32 %v2744_v42, %v2743_v16  ;;  %v2734_v57 = vpop.f32.mrf.mxu0 }
 0x16f   :  { %v2746_v6 = vpop.f32.mrf.mxu1  ;;  %1669 = vst [vmem:[#allocation2 + $0x14] sm:$0xf] %v2614_v53  ;;  %v1540_v25 = vadd.f32 %v2733_v12, %v1475_v5 }
 0x170   :  { %1677 = vst [vmem:[#allocation2 + $0x44] sm:$0xf] %v2622_v61  ;;  %v1556_v46 = vadd.f32 %v2745_v11, %v1491_v3  ;;  %v2735_v51 = vpop.f32.mrf.mxu0 }
 0x171   :  { %v2747_v31 = vpop.f32.mrf.mxu1  ;;  %v2616_v35 = vpack.c.bf16 %v1540_v25, %v1540_v25  ;;  %v2736_v41 = vadd.f32 %v2735_v51, %v2734_v57 }
 0x172   :  { %v2624_v48 = vpack.c.bf16 %v1556_v46, %v1556_v46  ;;  %v2748_v54 = vadd.f32 %v2747_v31, %v2746_v6 }
 0x173   :  { %1671 = vst [vmem:[#allocation2 + $0x20] sm:$0xf] %v2616_v35  ;;  %v1543_v19 = vadd.f32 %v2736_v41, %v1478_v47 }
 0x174   :  { %1679 = vst [vmem:[#allocation2 + $0x50] sm:$0xf] %v2624_v48  ;;  %v1559_v8 = vadd.f32 %v2748_v54, %v1494_v40 }
 0x175   :  { %v2618_v13 = vpack.c.bf16 %v1543_v19, %v1543_v19 }
 0x176   :  { %v2626_v63 = vpack.c.bf16 %v1559_v8, %v1559_v8 }
 0x177   :  { %1673 = vst [vmem:[#allocation2 + $0x2c] sm:$0xf] %v2618_v13 }
 0x178   :  { %1681 = vst [vmem:[#allocation2 + $0x5c] sm:$0xf] %v2626_v63 }
 0x179 LB: > { %v4314_v10 = vld [vmem:[#allocation37_spill] sm:$0xff]  ;;  %v4315_v26 = vld [vmem:[#allocation35_spill] sm:$0xff]  ;;  %v4318_v32 = vld [vmem:[#allocation38_spill] sm:$0xff]  ;;  %v3128_v49 = vmov 0.0   ;;  %v3129_v0 = vmov 0   ;;  %vm3130_vm3 = vmmov 0   ;;  %v1756_v19 = vpack.c.bf16 %v3122_v24, %v3122_v24  ;;  %s3126_s2 = sphi %s4118_s2, %s1736_s2   ;;  %v3122_v24 = vphi %v4116_v24, %v1986_v24  }
 0x17a   : > { %v2596_v17 = vcombine.high %v4315_v26, %v4314_v10  ;;  %v2595_v33 = vcombine.low %v4315_v26, %v4314_v10  ;;  %v4316_v27 = vld [vmem:[#allocation33_spill] sm:$0xff]  ;;  %v4317_v55 = vld [vmem:[#allocation31_spill] sm:$0xff]  ;;  %v4319_v34 = vld [vmem:[#allocation36_spill] sm:$0xff]  ;;  %2770 = vmatprep.subr.bf16.mxu1 %v3128_v49  ;;  %1917 = vmatprep.mubr.bf16.mxu0 %v3129_v0  ;;  %s1738_s29 = ssub.s32 7, %s3126_s2  ;;  %s2627_s30 = smul.u32 12, %s3126_s2  ;;  %vm1989_vm6 = vcmask 523264  }
 0x17b   : > { %v2593_v2 = vcombine.high %v4317_v55, %v4316_v27  ;;  %v2592_v36 = vcombine.low %v4317_v55, %v4316_v27  ;;  %v2597_v9 = vcombine.low %v4319_v34, %v4318_v32  ;;  %v4320_v21 = vld [vmem:[#allocation29_spill] sm:$0xff]  ;;  %v4321_v37 = vld [vmem:[#allocation27_spill] sm:$0xff]  ;;  %v4322_v14 = vld [vmem:[#allocation34_spill] sm:$0xff]  ;;  %2786 = vmatprep.mubr.msk.bf16.mxu1 %vm3130_vm3, %v3128_v49  ;;  %s2628_s8 = smul.u32 12, %s1738_s29  ;;  %s2600_s11 = sshll.u32 %s3126_s2, 3  ;;  %vm1993_vm7 = vcmask 1048064  }
 0x17c   : > { %1885 = vmatprep.subr.bf16.mxu0 %v2596_v17  ;;  %v2590_v62 = vcombine.high %v4321_v37, %v4320_v21  ;;  %v4323_v18 = vld [vmem:[#allocation32_spill] sm:$0xff]  ;;  %v2589_v23 = vcombine.low %v4321_v37, %v4320_v21  ;;  %v4324_v28 = vld [vmem:[#allocation25_spill] sm:$0xff]  ;;  %v4325_v45 = vld [vmem:[#allocation23_spill] sm:$0xff]  ;;  %s1741_s9 = scalar_lea.vmem [#allocation2], %s2627_s30  ;;  %s2601_s12 = sshll.u32 %s1738_s29, 3 }
 0x17d   : > { %1886 = vmatpush1.bf16.msra.mxu0 %v2595_v33  ;;  %2771 = vmatpush3.bf16.msra.mxu1 %v2597_v9  ;;  %v2594_v22 = vcombine.low %v4323_v18, %v4322_v14  ;;  %v2587_v50 = vcombine.high %v4325_v45, %v4324_v28  ;;  %v4326_v38 = vld [vmem:[#allocation30_spill] sm:$0xff]  ;;  %v4327_v7 = vld [vmem:[#allocation28_spill] sm:$0xff]  ;;  %v2586_v60 = vcombine.low %v4325_v45, %v4324_v28  ;;  %v4328_v59 = vld [vmem:[#allocation21_spill] sm:$0xff]  ;;  %s1746_s10 = scalar_lea.vmem [#allocation2], %s2628_s8  ;;  %s1988_s13 = scalar_lea.vmem [#allocation3], %s2600_s11 }
 0x17e   : > { %1887 = vmatprep.subr.bf16.mxu0 %v2593_v2  ;;  %2772 = vmatprep.subr.bf16.mxu1 %v3128_v49  ;;  %v2591_v52 = vcombine.low %v4327_v7, %v4326_v38  ;;  %v4329_v29 = vld [vmem:[#allocation19_spill] sm:$0xff]  ;;  %v4330_v1 = vld [vmem:[#allocation26_spill] sm:$0xff]  ;;  %v4331_v16 = vld [vmem:[#allocation24_spill] sm:$0xff]  ;;  %s1992_s14 = scalar_lea.vmem [#allocation3], %s2601_s12  ;;  %s1736_s2 = sadd.s32 1, %s3126_s2  }
 0x17f   : > { %v2584_v44 = vcombine.high %v4329_v29, %v4328_v59  ;;  %v2588_v15 = vcombine.low %v4331_v16, %v4330_v1  ;;  %v2583_v56 = vcombine.low %v4329_v29, %v4328_v59  ;;  %v4332_v5 = vld [vmem:[#allocation17_spill] sm:$0xff]  ;;  %v4333_v30 = vld [vmem:[#allocation15_spill] sm:$0xff]  ;;  %v4334_v4 = vld [vmem:[#allocation22_spill] sm:$0xff]  ;;  %p1733_p0 = scmp.ge.s32.totalorder %s1736_s2, 8  }
 0x180   : > { %v2581_v3 = vcombine.high %v4333_v30, %v4332_v5  ;;  %v4335_v39 = vld [vmem:[#allocation20_spill] sm:$0xff]  ;;  %v2580_v53 = vcombine.low %v4333_v30, %v4332_v5  ;;  %v4336_v61 = vld [vmem:[#allocation13_spill] sm:$0xff]  ;;  %v4337_v12 = vld [vmem:[#allocation11_spill] sm:$0xff] }
 0x181   : > { %1888 = vmatpush1.bf16.msra.mxu0 %v2592_v36  ;;  %2773 = vmatpush3.bf16.msra.mxu1 %v2594_v22  ;;  %v2585_v42 = vcombine.low %v4335_v39, %v4334_v4  ;;  %v2578_v11 = vcombine.high %v4337_v12, %v4336_v61  ;;  %v4338_v20 = vld [vmem:[#allocation18_spill] sm:$0xff]  ;;  %v4339_v43 = vld [vmem:[#allocation16_spill] sm:$0xff]  ;;  %v2577_v6 = vcombine.low %v4337_v12, %v4336_v61  ;;  %v4340_v25 = vld [vmem:[#allocation9_spill] sm:$0xff] }
 0x182   : > { %1889 = vmatprep.subr.bf16.mxu0 %v2590_v62  ;;  %2774 = vmatprep.subr.bf16.mxu1 %v3128_v49  ;;  %v2582_v57 = vcombine.low %v4339_v43, %v4338_v20  ;;  %v4341_v46 = vld [vmem:[#allocation7_spill] sm:$0xff]  ;;  %v4342_v40 = vld [vmem:[#allocation14_spill] sm:$0xff]  ;;  %v4343_v51 = vld [vmem:[#allocation12_spill] sm:$0xff] }
 0x183   : > { %v2575_v47 = vcombine.high %v4341_v46, %v4340_v25  ;;  %v2579_v31 = vcombine.low %v4343_v51, %v4342_v40  ;;  %v2574_v35 = vcombine.low %v4341_v46, %v4340_v25  ;;  %v4344_v48 = vld [vmem:[#allocation10_spill] sm:$0xff]  ;;  %v4345_v41 = vld [vmem:[#allocation8_spill] sm:$0xff]  ;;  %vm1749_vm4 = vmpackc.low %vm3744_vm1, %vm1728_vm0 }
 0x184   : > { %v2576_v54 = vcombine.low %v4345_v41, %v4344_v48  ;;  %v1742_v8 = vld [vmem:[%s1741_s9] sm:$0xff]  ;;  %vm1750_vm5 = vmpackc.low %vm3748_vm2, %vm3748_vm2  ;;  %v3105_v40 = vld [vmem:[%s4239_s5 + $0x30] sm:$0xff] (%p1733_p0)  }
 0x185   : > { %1890 = vmatpush1.bf16.msra.mxu0 %v2589_v23  ;;  %2775 = vmatpush3.bf16.msra.mxu1 %v2591_v52  ;;  %v1747_v13 = vld [vmem:[%s1746_s10] sm:$0xff]  ;;  %v3108_v45 = vld [vmem:[%s4239_s5 + $0x18] sm:$0xff] (%p1733_p0)   ;;  %v3109_v59 = vld [vmem:[%s4239_s5 + $0x10] sm:$0xff] (%p1733_p0)  }
 0x186   : > { %1891 = vmatprep.subr.bf16.mxu0 %v2587_v50  ;;  %2776 = vmatprep.subr.bf16.mxu1 %v3128_v49  ;;  %v1751_v33 = vsel %vm1749_vm4, %v1742_v8, %v1747_v13  ;;  %v3107_v10 = vld [vmem:[%s4239_s5 + $0x20] sm:$0xff] (%p1733_p0)   ;;  %v3110_v29 = vld [vmem:[%s4239_s5 + $0x8] sm:$0xff] (%p1733_p0)  }
 0x187   : > { %v1753_v2 = vunpack.c.l.bf16 %v1751_v33  ;;  %v1754_v22 = vunpack.c.h.bf16 %v1751_v33  ;;  %v3111_v5 = vld [vmem:[%s4239_s5] sm:$0xff] (%p1733_p0)  }
 0x189   : > { %1892 = vmatpush1.bf16.msra.mxu0 %v2586_v60  ;;  %2777 = vmatpush3.bf16.msra.mxu1 %v2588_v15  ;;  %v1743_v60 = vld [vmem:[%s1741_s9 + $0x8] sm:$0xf]  ;;  %v4349_v15 = vld [vmem:[#allocation39_spill] sm:$0xff] }
 0x18a   : > { %1893 = vmatprep.subr.bf16.mxu0 %v2584_v44  ;;  %2778 = vmatprep.subr.bf16.mxu1 %v3128_v49  ;;  %v1748_v44 = vld [vmem:[%s1746_s10 + $0x8] sm:$0xf] }
 0x18b   : > { %v1752_v16 = vsel %vm1750_vm5, %v1743_v60, %v1748_v44 }
 0x18c   : > { %v1755_v4 = vunpack.c.l.bf16 %v1752_v16 }
 0x18d   : > { %1894 = vmatpush1.bf16.msra.mxu0 %v2583_v56  ;;  %2779 = vmatpush3.bf16.msra.mxu1 %v2585_v42 }
 0x18e   : > { %1895 = vmatprep.subr.bf16.mxu0 %v2581_v3  ;;  %2780 = vmatprep.subr.bf16.mxu1 %v3128_v49 }
 0x191   : > { %1896 = vmatpush1.bf16.msra.mxu0 %v2580_v53  ;;  %2781 = vmatpush3.bf16.msra.mxu1 %v2582_v57 }
 0x192   : > { %1897 = vmatprep.subr.bf16.mxu0 %v2578_v11  ;;  %2782 = vmatprep.subr.bf16.mxu1 %v3128_v49 }
 0x195   : > { %1898 = vmatpush1.bf16.msra.mxu0 %v2577_v6  ;;  %2783 = vmatpush3.bf16.msra.mxu1 %v2579_v31  ;;  %v2602_v31 = vld [vmem:[%s4240_s6] ss:$0 sm:$0xff] (%p1733_p0) }
 0x196   : > { %1899 = vmatprep.subr.bf16.mxu0 %v2575_v47  ;;  %2784 = vmatprep.subr.bf16.mxu1 %v3128_v49  ;;  %v3104_v47 = vld [vmem:[%s4239_s5 + $0x38] sm:$0xff] (%p1733_p0)  }
 0x199   : > { %1900 = vmatpush1.bf16.msra.mxu0 %v2574_v35  ;;  %2785 = vmatpush3.bf16.msra.mxu1 %v2576_v54 }
 0x19a   :  { %2790 = vmatprep.subr.bf16.mxu0 (%p1733_p0), %v3104_v47  ;;  %2830 = vmatprep.subr.bf16.mxu1 (%p1733_p0), %v3104_v47 }
 0x19c   : > { %1918 = vmatmul.mubr.bf16.vlgmr.msra.gmra.mxu0 %v1756_v19  ;;  %2787 = vmatmul.mubr.bf16.vlgmr.msra.gmra.mxu1 %v1756_v19 }
 0x19d   :  { %2791 = vmatpush3.bf16.msra.mxu0 (%p1733_p0), %v3104_v47  ;;  %2838 = vmatpush3.bf16.msra.mxu1 (%p1733_p0), %v3104_v47 }
 0x19e   :  { %2792 = vmatprep.subr.bf16.mxu0 (%p1733_p0), %v3105_v40  ;;  %2831 = vmatprep.subr.bf16.mxu1 (%p1733_p0), %v3105_v40 }
 0x1a1   :  { %2793 = vmatpush3.bf16.msra.mxu0 (%p1733_p0), %v3105_v40  ;;  %2839 = vmatpush3.bf16.msra.mxu1 (%p1733_p0), %v3105_v40 }
 0x25c   : > { %v1919_v36 = vpop.f32.mrf.mxu0  ;;  %v1960_v9 = vpop.f32.mrf.mxu1 }
 0x25d   : > { %v1966_v32 = vadd.f32 %v1919_v36, %v1753_v2  ;;  %v1980_v56 = vadd.f32 %v4349_v15, %v1960_v9 }
 0x25e   : > { %v1921_v34 = vpop.f32.mrf.mxu0  ;;  %v2788_v0 = vpop.f32.mrf.mxu1 }
 0x25f   : > { %v2598_v62 = vmul.f32 -1.442695, %v1966_v32  ;;  %v1973_v50 = vadd.f32 %v1921_v34, %v1754_v22  ;;  %v4350_v0 = vld [vmem:[#allocation4_spill] sm:$0xff] (%p1733_p0) }
 0x260   : > { %v1923_v49 = vpop.f32.mrf.mxu0  ;;  %v1963_v18 = vpop.f32.mrf.mxu1 }
 0x261   : > { %3094 = vpow2.f32 %v2598_v62  ;;  %v2599_v38 = vmul.f32 -1.442695, %v1973_v50 }
 0x262   : > { %v1924_v14 = vpop.f32.mrf.mxu0  ;;  %v2789_v23 = vpop.f32.mrf.mxu1 }
 0x263   : > { %3096 = vpow2.f32 %v2599_v38 }
 0x26e   : > { %v3095_v7 = vpop.eup %3094 }
 0x26f   : > { %v1970_v52 = vadd.f32 1.0, %v3095_v7 }
 0x270   : > { %v3097_v3 = vpop.eup %3096 }
 0x271   : > { %3098 = vrcp.f32 %v1970_v52  ;;  %v1977_v53 = vadd.f32 1.0, %v3097_v3 }
 0x27e   : > { %v3099_v39 = vpop.eup %3098 }
 0x27f   : > { %v1981_v42 = vmul.f32 %v3099_v39, %v1980_v56 }
 0x281   : > { %v1982_v11 = vadd.f32 %v1981_v42, %v1755_v4 }
 0x283   : > { %3100 = vtanh.f32 %v1982_v11 }
 0x284   : > { %3102 = vrcp.f32 %v1977_v53 }
 0x290   : > { %v3101_v20 = vpop.eup %3100 }
 0x291   : > { %v1984_v43 = vsub.f32 %v3122_v24, %v3101_v20  ;;  %v3103_v57 = vpop.eup %3102 }
 0x293   : > { %v1985_v6 = vmul.f32 %v3103_v57, %v1984_v43 }
 0x294   :  { %1735 = sbr.rel (!%p1733_p0) target bundleno = 377 (0x179), region = 59 }
 0x295   : > { %v1986_v24 = vadd.f32 %v3101_v20, %v1985_v6  }
 0x297   : > { %1990 = vst.msk [vmem:[%s1988_s13] sm:$0xff] %vm1989_vm6, %v1986_v24 }
 0x298   : > { %1994 = vst.msk [vmem:[%s1992_s14] sm:$0xff] %vm1993_vm7, %v1986_v24  ;;  %v3106_v24 = vld [vmem:[%s4239_s5 + $0x28] sm:$0xff] (%p1733_p0)  }
 0x299   :  { %2794 = vmatprep.subr.bf16.mxu0 %v3106_v24  ;;  %2832 = vmatprep.subr.bf16.mxu1 %v3106_v24 }
 0x29a   :  { %2795 = vmatpush3.bf16.msra.mxu0 %v3106_v24  ;;  %2840 = vmatpush3.bf16.msra.mxu1 %v3106_v24 }
 0x29b   :  { %2796 = vmatprep.subr.bf16.mxu0 %v3107_v10  ;;  %2833 = vmatprep.subr.bf16.mxu1 %v3107_v10 }
 0x29e   :  { %2797 = vmatpush3.bf16.msra.mxu0 %v3107_v10  ;;  %2841 = vmatpush3.bf16.msra.mxu1 %v3107_v10 }
 0x29f   :  { %v1995_v26 = vld [vmem:[#allocation3] sm:$0xff]  ;;  %v1996_v27 = vld [vmem:[#allocation3 + $0x8] sm:$0xff]  ;;  %2798 = vmatprep.subr.bf16.mxu0 %v3108_v45  ;;  %2834 = vmatprep.subr.bf16.mxu1 %v3108_v45  ;;  %v1997_v30 = vld [vmem:[#allocation3 + $0x10] sm:$0xff] }
 0x2a0   :  { %v1999_v55 = vld [vmem:[#allocation3 + $0x20] sm:$0xff]  ;;  %v2003_v21 = vpack.c.bf16 %v1996_v27, %v1995_v26  ;;  %v2000_v37 = vld [vmem:[#allocation3 + $0x28] sm:$0xff]  ;;  %v1998_v61 = vld [vmem:[#allocation3 + $0x18] sm:$0xff] }
 0x2a1   :  { %v2005_v28 = vpack.c.bf16 %v2000_v37, %v1999_v55  ;;  %v2001_v12 = vld [vmem:[#allocation3 + $0x30] sm:$0xff]  ;;  %v2002_v25 = vld [vmem:[#allocation3 + $0x38] sm:$0xff]  ;;  %v2004_v46 = vpack.c.bf16 %v1998_v61, %v1997_v30 }
 0x2a2   :  { %2806 = vmatprep.mubr.bf16.mxu0 %v2003_v21  ;;  %2799 = vmatpush3.bf16.msra.mxu0 %v3108_v45  ;;  %v2006_v51 = vpack.c.bf16 %v2002_v25, %v2001_v12 }
 0x2a3   :  { %2810 = vmatprep.mubr.bf16.mxu1 %v2005_v28  ;;  %2842 = vmatpush3.bf16.msra.mxu1 %v3108_v45 }
 0x2a4   :  { %2800 = vmatprep.subr.bf16.mxu0 %v3109_v59  ;;  %2835 = vmatprep.subr.bf16.mxu1 %v3109_v59 }
 0x2a6   :  { %2801 = vmatpush3.bf16.msra.mxu0 %v3109_v59 }
 0x2a7   :  { %2843 = vmatpush3.bf16.msra.mxu1 %v3109_v59  ;;  %2802 = vmatprep.subr.bf16.mxu0 %v3110_v29 }
 0x2a8   :  { %2836 = vmatprep.subr.bf16.mxu1 %v3110_v29 }
 0x2aa   :  { %2803 = vmatpush3.bf16.msra.mxu0 %v3110_v29 }
 0x2ab   :  { %2844 = vmatpush3.bf16.msra.mxu1 %v3110_v29  ;;  %2804 = vmatprep.subr.bf16.mxu0 %v3111_v5 }
 0x2ac   :  { %2837 = vmatprep.subr.bf16.mxu1 %v3111_v5 }
 0x2ae   :  { %2805 = vmatpush3.bf16.msra.mxu0 %v3111_v5 }
 0x2af   :  { %2845 = vmatpush3.bf16.msra.mxu1 %v3111_v5 }
 0x2b1   :  { %2807 = vmatmul.mubr.bf16.vlgmr.msra.gmra.mxu0 %v2004_v46 }
 0x2b2   :  { %2811 = vmatmul.mubr.bf16.vlgmr.msra.gmra.mxu1 %v2006_v51 }
 0x371   :  { %v2808_v35 = vpop.f32.mrf.mxu0 }
 0x372   :  { %v2812_v48 = vpop.f32.mrf.mxu1  ;;  %v2121_v41 = vadd.f32 %v2808_v35, %v2602_v31 }
 0x373   :  { %v2112_v54 = vpop.f32.mrf.mxu0  ;;  %v2137_v62 = vadd.f32 %v2812_v48, %v2602_v31 }
 0x374   :  { %v2128_v19 = vpop.f32.mrf.mxu1  ;;  %v2113_v8 = vadd.f32 %v2602_v31, %v2112_v54  ;;  %2147 = vmax.xlane.f32.xlu1 %v2121_v41 }
 0x375   :  { %v2809_v13 = vpop.f32.mrf.mxu0  ;;  %v2129_v34 = vadd.f32 %v2602_v31, %v2128_v19 }
 0x376   :  { %v2813_v63 = vpop.f32.mrf.mxu1  ;;  %v2124_v17 = vadd.f32 %v2809_v13, %v2602_v31  ;;  %2143 = vmax.xlane.f32.xlu0 %v2113_v8 }
 0x377   :  { %v2115_v33 = vpop.f32.mrf.mxu0  ;;  %v2140_v9 = vadd.f32 %v2813_v63, %v2602_v31 }
 0x378   :  { %v2131_v2 = vpop.f32.mrf.mxu1  ;;  %v2116_v36 = vadd.f32 %v2602_v31, %v2115_v33  ;;  %2149 = vmax.xlane.f32.xlu1 %v2124_v17 }
 0x379   :  { %v2132_v32 = vadd.f32 %v2602_v31, %v2131_v2 }
 0x37a   :  { %2145 = vmax.xlane.f32.xlu0 %v2116_v36 }
 0x37c   :  { %2153 = vmax.xlane.f32.xlu1 %v2132_v32 }
 0x37e   :  { %2151 = vmax.xlane.f32.xlu0 %v2129_v34 }
 0x380   :  { %2157 = vmax.xlane.f32.xlu1 %v2140_v9 }
 0x382   :  { %2155 = vmax.xlane.f32.xlu0 %v2137_v62 }
 0x3fd   :  { %v2148_v49 = vpop.xlane.xlu1 %2147 }
 0x3fe   :  { %vm2161_vm8 = vcmp.ge.f32.partialorder %v2121_v41, %v2148_v49 }
 0x3ff   :  { %v2169_v14 = vsel %vm2161_vm8, %v4350_v0, 128  ;;  %v2144_v18 = vpop.xlane.xlu0 %2143  ;;  %vm2319_vm8 = vcmask 1041409  }
 0x400   :  { %v2204_v22 = vshra.s32 %v2169_v14, 16  ;;  %vm2159_vm9 = vcmp.ge.f32.partialorder %v2113_v8, %v2144_v18  ;;  %v2203_v21 = vand.u32 65535, %v2169_v14 }
 0x401   :  { %v2167_v23 = vsel %vm2159_vm9, %v4350_v0, 128  ;;  %v2150_v50 = vpop.xlane.xlu1 %2149  ;;  %vm2321_vm9 = vcmask 1042434  }
 0x402   :  { %vm2162_vm10 = vcmp.ge.f32.partialorder %v2124_v17, %v2150_v50  ;;  %v2176_v38 = vshra.s32 %v2167_v23, 16  ;;  %v2206_v60 = vcvt.s32.f32 %v2204_v22  ;;  %v2205_v37 = vcvt.s32.f32 %v2203_v21 }
 0x403   :  { %v2170_v7 = vsel %vm2162_vm10, %v4350_v0, 128  ;;  %v2146_v52 = vpop.xlane.xlu0 %2145  ;;  %v2175_v28 = vand.u32 65535, %v2167_v23  ;;  %vm2323_vm10 = vcmask 1043459  }
 0x404   :  { %v2218_v44 = vshra.s32 %v2170_v7, 16  ;;  %vm2160_vm11 = vcmp.ge.f32.partialorder %v2116_v36, %v2146_v52  ;;  %2207 = vmin.xlane.f32.xlu0 %v2206_v60  ;;  %v2178_v4 = vcvt.s32.f32 %v2176_v38  ;;  %v2217_v45 = vand.u32 65535, %v2170_v7 }
 0x405   :  { %v2168_v1 = vsel %vm2160_vm11, %v4350_v0, 128  ;;  %v2154_v16 = vpop.xlane.xlu1 %2153  ;;  %v2177_v5 = vcvt.s32.f32 %v2175_v28  ;;  %vm2325_vm11 = vcmask 1044484  }
 0x406   :  { %vm2164_vm12 = vcmp.ge.f32.partialorder %v2132_v32, %v2154_v16  ;;  %v2190_v15 = vshra.s32 %v2168_v1, 16  ;;  %v2220_v3 = vcvt.s32.f32 %v2218_v44  ;;  %v2219_v30 = vcvt.s32.f32 %v2217_v45 }
 0x407   :  { %v2152_v56 = vpop.xlane.xlu0 %2151  ;;  %v2172_v39 = vsel %vm2164_vm12, %v4350_v0, 128  ;;  %v2189_v61 = vand.u32 65535, %v2168_v1  ;;  %vm2327_vm12 = vcmask 1045509  }
 0x408   :  { %vm2163_vm13 = vcmp.ge.f32.partialorder %v2129_v34, %v2152_v56  ;;  %2221 = vmin.xlane.f32.xlu1 %v2220_v3  ;;  %2179 = vmin.xlane.f32.xlu0 %v2178_v4  ;;  %v2246_v20 = vshra.s32 %v2172_v39, 16  ;;  %v2192_v57 = vcvt.s32.f32 %v2190_v15  ;;  %v2245_v48 = vand.u32 65535, %v2172_v39 }
 0x409   :  { %v2171_v42 = vsel %vm2163_vm13, %v4350_v0, 128  ;;  %v2158_v53 = vpop.xlane.xlu1 %2157  ;;  %v2191_v35 = vcvt.s32.f32 %v2189_v61  ;;  %vm2329_vm13 = vcmask 1046534  }
 0x40a   :  { %v2232_v11 = vshra.s32 %v2171_v42, 16  ;;  %vm2166_vm14 = vcmp.ge.f32.partialorder %v2140_v9, %v2158_v53  ;;  %v2248_v26 = vcvt.s32.f32 %v2246_v20  ;;  %v2231_v46 = vand.u32 65535, %v2171_v42 }
 0x40b   :  { %v2156_v43 = vpop.xlane.xlu0 %2155  ;;  %v2174_v6 = vsel %vm2166_vm14, %v4350_v0, 128  ;;  %v2247_v63 = vcvt.s32.f32 %v2245_v48  ;;  %vm2331_vm14 = vcmask 1047559  }
 0x40c   :  { %vm2165_vm15 = vcmp.ge.f32.partialorder %v2137_v62, %v2156_v43  ;;  %2193 = vmin.xlane.f32.xlu1 %v2192_v57  ;;  %v2234_v40 = vcvt.s32.f32 %v2232_v11  ;;  %v2274_v10 = vshra.s32 %v2174_v6, 16  ;;  %v2233_v54 = vcvt.s32.f32 %v2231_v46 }
 0x40d   :  { %v2173_v47 = vsel %vm2165_vm15, %v4350_v0, 128  ;;  %v2273_v17 = vand.u32 65535, %v2174_v6  ;;  %v2289_v43 = vsub.s32 %v4350_v0, %v3989_v58  ;;  %vm2365_vm15 = vcmask 64512  }
 0x40e   :  { %v2260_v24 = vshra.s32 %v2173_v47, 16  ;;  %2235 = vmin.xlane.f32.xlu0 %v2234_v40  ;;  %v2276_v55 = vcvt.s32.f32 %v2274_v10  ;;  %v2259_v19 = vand.u32 65535, %v2173_v47 }
 0x40f   :  { %v2275_v9 = vcvt.s32.f32 %v2273_v17 }
 0x410   :  { %v2262_v27 = vcvt.s32.f32 %v2260_v24  ;;  %2249 = vmin.xlane.f32.xlu1 %v2248_v26  ;;  %v2261_v36 = vcvt.s32.f32 %v2259_v19 }
 0x412   :  { %2263 = vmin.xlane.f32.xlu0 %v2262_v27 }
 0x414   :  { %2277 = vmin.xlane.f32.xlu1 %v2276_v55 }
 0x48d   :  { %v2208_v59 = vpop.xlane.xlu0 %2207 }
 0x48e   :  { %vm2209_vm0 = vcmp.eq.f32.partialorder %v2206_v60, %v2208_v59  ;;  %v2214_v23 = vcvt.f32.s32 %v2208_v59 }
 0x48f   :  { %v2210_v29 = vsel %vm2209_vm0, %v2205_v37, inf }
 0x490   :  { %2211 = vmin.xlane.f32.xlu0 %v2210_v29 }
 0x491   :  { %v2222_v12 = vpop.xlane.xlu1 %2221  ;;  %v2180_v25 = vpop.xlane.xlu0 %2179 }
 0x492   :  { %vm2223_vm1 = vcmp.eq.f32.partialorder %v2220_v3, %v2222_v12  ;;  %vm2181_vm2 = vcmp.eq.f32.partialorder %v2178_v4, %v2180_v25  ;;  %v2186_v22 = vcvt.f32.s32 %v2180_v25  ;;  %v2228_v50 = vcvt.f32.s32 %v2222_v12 }
 0x493   :  { %v2224_v51 = vsel %vm2223_vm1, %v2219_v30, inf  ;;  %v2182_v31 = vsel %vm2181_vm2, %v2177_v5, inf  ;;  %v2215_v3 = vshll.u32 %v2214_v23, 16 }
 0x494   :  { %2225 = vmin.xlane.f32.xlu1 %v2224_v51  ;;  %2183 = vmin.xlane.f32.xlu0 %v2182_v31  ;;  %v2187_v16 = vshll.u32 %v2186_v22, 16  ;;  %v2229_v4 = vshll.u32 %v2228_v50, 16 }
 0x495   :  { %v2194_v41 = vpop.xlane.xlu1 %2193 }
 0x496   :  { %vm2195_vm3 = vcmp.eq.f32.partialorder %v2192_v57, %v2194_v41  ;;  %v2200_v52 = vcvt.f32.s32 %v2194_v41 }
 0x497   :  { %v2236_v8 = vpop.xlane.xlu0 %2235  ;;  %v2196_v13 = vsel %vm2195_vm3, %v2191_v35, inf }
 0x498   :  { %2197 = vmin.xlane.f32.xlu1 %v2196_v13  ;;  %vm2237_vm4 = vcmp.eq.f32.partialorder %v2234_v40, %v2236_v8  ;;  %v2242_v15 = vcvt.f32.s32 %v2236_v8  ;;  %v2201_v53 = vshll.u32 %v2200_v52, 16 }
 0x499   :  { %v2250_v33 = vpop.xlane.xlu1 %2249  ;;  %v2238_v2 = vsel %vm2237_vm4, %v2233_v54, inf }
 0x49a   :  { %2239 = vmin.xlane.f32.xlu0 %v2238_v2  ;;  %vm2251_vm5 = vcmp.eq.f32.partialorder %v2248_v26, %v2250_v33  ;;  %v2256_v56 = vcvt.f32.s32 %v2250_v33  ;;  %v2243_v40 = vshll.u32 %v2242_v15, 16 }
 0x49b   :  { %v2264_v32 = vpop.xlane.xlu0 %2263  ;;  %v2252_v34 = vsel %vm2251_vm5, %v2247_v63, inf }
 0x49c   :  { %2253 = vmin.xlane.f32.xlu1 %v2252_v34  ;;  %vm2265_vm6 = vcmp.eq.f32.partialorder %v2262_v27, %v2264_v32  ;;  %v2270_v39 = vcvt.f32.s32 %v2264_v32  ;;  %v2257_v24 = vshll.u32 %v2256_v56, 16 }
 0x49d   :  { %v2278_v62 = vpop.xlane.xlu1 %2277  ;;  %v2266_v49 = vsel %vm2265_vm6, %v2261_v36, inf }
 0x49e   :  { %2267 = vmin.xlane.f32.xlu0 %v2266_v49  ;;  %vm2279_vm7 = vcmp.eq.f32.partialorder %v2276_v55, %v2278_v62  ;;  %v2271_v27 = vshll.u32 %v2270_v39, 16  ;;  %v2284_v55 = vcvt.f32.s32 %v2278_v62 }
 0x49f   :  { %v2280_v14 = vsel %vm2279_vm7, %v2275_v9, inf }
 0x4a0   :  { %2281 = vmin.xlane.f32.xlu1 %v2280_v14  ;;  %v2285_v25 = vshll.u32 %v2284_v55, 16 }
 0x519   :  { %v2212_v18 = vpop.xlane.xlu0 %2211 }
 0x51a   :  { %v2213_v44 = vcvt.f32.s32 %v2212_v18 }
 0x51c   :  { %v2216_v57 = vadd.s32 %v2215_v3, %v2213_v44 }
 0x51d   :  { %v2226_v38 = vpop.xlane.xlu1 %2225  ;;  %v2184_v7 = vpop.xlane.xlu0 %2183 }
 0x51e   :  { %v2185_v60 = vcvt.f32.s32 %v2184_v7  ;;  %v2227_v1 = vcvt.f32.s32 %v2226_v38  ;;  %v2298_v29 = vrot.slane %v2216_v57, %v2289_v43 }
 0x520   :  { %v2188_v11 = vadd.s32 %v2187_v16, %v2185_v60  ;;  %v2230_v6 = vadd.s32 %v2229_v4, %v2227_v1 }
 0x521   :  { %v2198_v42 = vpop.xlane.xlu1 %2197 }
 0x522   :  { %v2199_v20 = vcvt.f32.s32 %v2198_v42  ;;  %v2290_v37 = vrot.slane %v2188_v11, %v2289_v43  ;;  %v2302_v5 = vrot.slane %v2230_v6, %v2289_v43 }
 0x523   :  { %v2240_v47 = vpop.xlane.xlu0 %2239 }
 0x524   :  { %v2202_v10 = vadd.s32 %v2201_v53, %v2199_v20  ;;  %v2241_v26 = vcvt.f32.s32 %v2240_v47 }
 0x525   :  { %v2254_v21 = vpop.xlane.xlu1 %2253 }
 0x526   :  { %v2294_v28 = vrot.slane %v2202_v10, %v2289_v43  ;;  %v2244_v45 = vadd.s32 %v2243_v40, %v2241_v26  ;;  %v2255_v59 = vcvt.f32.s32 %v2254_v21 }
 0x527   :  { %v2268_v30 = vpop.xlane.xlu0 %2267 }
 0x528   :  { %v2320_v58 = vsel %vm2319_vm8, %v2294_v28, %v2290_v37  ;;  %v2306_v0 = vrot.slane %v2244_v45, %v2289_v43  ;;  %v2258_v61 = vadd.s32 %v2257_v24, %v2255_v59  ;;  %v2269_v12 = vcvt.f32.s32 %v2268_v30 }
 0x529   :  { %v2322_v46 = vsel %vm2321_vm9, %v2298_v29, %v2320_v58  ;;  %v2282_v51 = vpop.xlane.xlu1 %2281 }
 0x52a   :  { %v2310_v31 = vrot.slane %v2258_v61, %v2289_v43  ;;  %v2272_v35 = vadd.s32 %v2271_v27, %v2269_v12  ;;  %v2283_v48 = vcvt.f32.s32 %v2282_v51  ;;  %v2324_v41 = vsel %vm2323_vm10, %v2302_v5, %v2322_v46 }
 0x52b   :  { %v2326_v54 = vsel %vm2325_vm11, %v2306_v0, %v2324_v41 }
 0x52c   :  { %v2314_v19 = vrot.slane %v2272_v35, %v2289_v43  ;;  %v2286_v8 = vadd.s32 %v2285_v25, %v2283_v48  ;;  %v2328_v13 = vsel %vm2327_vm12, %v2310_v31, %v2326_v54 }
 0x52e   :  { %v2318_v63 = vrot.slane %v2286_v8, %v2289_v43  ;;  %v2330_v17 = vsel %vm2329_vm13, %v2314_v19, %v2328_v13 }
 0x530   :  { %v2332_v33 = vsel %vm2331_vm14, %v2318_v63, %v2330_v17 }
 0x531   :  { %2333 = vxpose.xlu0.b32.start.end [1/1] (short) (narrow) %v2332_v33, 8 }
 0x5ad   :  { %v2349_v2 = vpop.trf.xlu0 }
 0x5ae   :  { %2366 = vst.msk [vmem:[%s4241_s7] sm:$0xff] %vm2365_vm15, %v2349_v2 }

</bundles_post_ra>
